<compile_context>
chip_gen: v5e
topology: v5e:2x2
jax: 0.10.0
libtpu: 0.0.40
codegen_flags: <defaults>
</compile_context>

<pallas_src>
import functools

import jax
import jax.numpy as jnp
from jax.experimental import pallas as pl
from jax.experimental.pallas import tpu as pltpu


def _round_up(v, m):
    return (v + m - 1) // m * m


def _ffn_kernel(x_ref, w1t_ref, w3t_ref, w2t_ref, rmsw_ref, o_ref, *,
                hidden_true, norm_eps, row_chunks):
    """One (tm, dim_p) row tile -> (tm, dim_p) output tile.

    Per-row dequant scales and the RMSNorm rsqrt are folded into per-row (rows,1)
    scalars that only touch the second quant scale and the final f32 accumulator,
    so the full-width (rows, hid_p) work between the MXU dots is just:
    relu^2 gate, rms-weight multiply, sum(h^2), abs-max, round/clip/cast.
    The tile is split into `row_chunks` independent row slices so the scheduler can
    overlap chunk k+1's MXU dots with chunk k's VPU/XLU tail.
    """
    tm = x_ref.shape[0]
    rows = tm // row_chunks

    rmsw = rmsw_ref[...]          # (1, hid_p)
    w1t = w1t_ref[...]
    w3t = w3t_ref[...]
    w2t = w2t_ref[...]

    for c in range(row_chunks):                     # static unroll; chunks independent
        sl = pl.ds(c * rows, rows)
        x = x_ref[sl, :]                                          # (rows, dim_p) f32

        # --- BitLinear.quant_input on x (per-row int8 fake quant) -----------------
        # Integer-valued activations go to the MXU as bf16 (exact up to |128|); the
        # 1/s dequant scale is folded into the per-row scalars below.
        rm = jnp.maximum(jnp.max(jnp.abs(x), axis=-1, keepdims=True), 1e-5)
        xq = jnp.clip(jnp.round(x * (127.0 / rm)), -128.0, 127.0).astype(jnp.bfloat16)
        inv_s = rm * (1.0 / 127.0)                                # (rows, 1)

        # --- w13 as two dots on the unscaled int-valued activations ---------------
        x1r = jnp.dot(xq, w1t, preferred_element_type=jnp.float32)   # (rows, hid_p)
        x3r = jnp.dot(xq, w3t, preferred_element_type=jnp.float32)

        # --- squared-relu gate on the raw values: true h = inv_s^3 * hr -----------
        hr = jnp.square(jnp.maximum(x1r, 0.0)) * x3r              # (rows, hid_p)
        g = hr * rmsw                                             # h_raw * rms weight

        # --- RMSNorm stats over the true hidden width (padded cols are exactly 0) --
        ssq = jnp.sum(hr * hr, axis=-1, keepdims=True)            # (rows, 1)
        inv_s3 = inv_s * inv_s * inv_s
        ms = (inv_s3 * inv_s3) * ssq * (1.0 / hidden_true)        # mean(h^2)
        c_row = inv_s3 * jax.lax.rsqrt(ms + norm_eps)             # inner = c_row * g

        # --- BitLinear.quant_input on inner, folded to per-row scalars ------------
        gmax = jnp.max(jnp.abs(g), axis=-1, keepdims=True)
        rm2 = jnp.maximum(c_row * gmax, 1e-5)                     # max(|inner|, 1e-5)
        qscale = c_row * (127.0 / rm2)                            # == 127/gmax if floor off
        innerq = jnp.clip(jnp.round(g * qscale), -128.0, 127.0).astype(jnp.bfloat16)
        inv_s2 = rm2 * (1.0 / 127.0)

        # --- w2: inner @ W2^T, dequant applied to the f32 accumulator -------------
        o_ref[sl, :] = jnp.dot(innerq, w2t,
                               preferred_element_type=jnp.float32) * inv_s2


def prepare_ffn_params(w13, w2, rms_weight):
    """One-time weight prep (do NOT pay this per forward call).

    w13: (2*hidden, dim), w2: (dim, hidden) in PyTorch (out, in) layout.
    Returns transposed-to-(in, out), lane-padded (multiples of 128), bf16 weights.
    """
    two_hidden, dim = w13.shape
    hidden = two_hidden // 2
    assert w2.shape == (dim, hidden)
    dim_p = _round_up(dim, 128)
    hid_p = _round_up(hidden, 128)

    def pad_t(w, rows_p, cols_p):
        wt = jnp.transpose(w).astype(jnp.float32)     # (in, out)
        return jnp.pad(wt, ((0, rows_p - wt.shape[0]), (0, cols_p - wt.shape[1])))

    w1t = pad_t(w13[:hidden, :], dim_p, hid_p).astype(jnp.bfloat16)   # (dim_p, hid_p)
    w3t = pad_t(w13[hidden:, :], dim_p, hid_p).astype(jnp.bfloat16)   # (dim_p, hid_p)
    w2t = pad_t(w2, hid_p, dim_p).astype(jnp.bfloat16)                # (hid_p, dim_p)
    rmsw = jnp.pad(rms_weight.astype(jnp.float32),
                   (0, hid_p - hidden)).reshape(1, hid_p)

    return dict(w1t=w1t, w3t=w3t, w2t=w2t, rmsw=rmsw,
                dim=dim, hidden=hidden, dim_p=dim_p, hid_p=hid_p)


def _vmem_capacity_bytes():
    try:
        cap = int(pltpu.get_tpu_info().vmem_capacity_bytes)
        return min(max(cap, 32 * 1024 * 1024), 256 * 1024 * 1024)
    except Exception:
        return 64 * 1024 * 1024   # conservative fallback (v7x per-core VMEM)


def feed_forward_pallas(x, params, norm_eps, *, tm_rows=256):
    """x: (..., dim) f32; params from prepare_ffn_params."""
    dim, hidden = params["dim"], params["hidden"]
    dim_p, hid_p = params["dim_p"], params["hid_p"]

    lead_shape = x.shape[:-1]
    M = 1
    for d in lead_shape:
        M *= d

    # --- generation-aware VMEM budgeting --------------------------------------
    vmem_cap = _vmem_capacity_bytes()
    vmem_limit = max(int(0.85 * vmem_cap), 32 * 1024 * 1024)  # headroom for Mosaic scratch
    budget = int(0.80 * vmem_limit)

    wbuf = 1                                      # invariant weights single-buffered
    weight_bytes = wbuf * (3 * dim_p * hid_p * 2 + hid_p * 4)
    # per-row: double-buffered f32 x/out tiles + ~6 live (row, hid_p) f32 temporaries
    per_row_bytes = 2 * 2 * dim_p * 4 + 6 * hid_p * 4
    # TODO(synk): if weight_bytes alone exceeds the budget (production sizes on v7x),
    # switch to a weight-streaming kernel instead of just shrinking tm here.
    tm_cap = max(8, min(tm_rows,
                        ((budget - weight_bytes) // max(per_row_bytes, 1)) // 8 * 8))

    # --- row-tile / grid selection: force >=2 tiles for megacore when M is large,
    #     and pick tm as a near-divisor of M (multiple of 16) to avoid padding waste.
    grid_m = max(1, pl.cdiv(M, tm_cap))
    if M > 128:
        grid_m = max(grid_m, 2)
    tm = min(tm_cap, _round_up(pl.cdiv(M, grid_m), 16))
    grid_m = pl.cdiv(M, tm)
    m_p = grid_m * tm

    row_chunks = 2 if (tm % 16 == 0) else 1

    x2d = x.reshape(M, dim).astype(jnp.float32)
    x2d = jnp.pad(x2d, ((0, m_p - M), (0, dim_p - dim)))

    kernel = functools.partial(_ffn_kernel, hidden_true=float(hidden),
                               norm_eps=float(norm_eps), row_chunks=row_chunks)

    flops = 2 * M * dim * (2 * hidden) + 2 * M * hidden * dim
    bytes_accessed = (m_p * dim_p * 4            # x in
                      + m_p * dim_p * 4          # out
                      + 3 * dim_p * hid_p * 2    # bf16 weights
                      + hid_p * 4)               # rms weight
    cost = pl.CostEstimate(flops=flops, transcendentals=2 * M,
                           bytes_accessed=bytes_accessed)

    def run(single_buffer_weights):
        wkw = dict(pipeline_mode=pl.Buffered(1)) if single_buffer_weights else {}
        call = pl.pallas_call(
            kernel,
            out_shape=jax.ShapeDtypeStruct((m_p, dim_p), jnp.float32),
            grid=(grid_m,),
            in_specs=[
                pl.BlockSpec((tm, dim_p), lambda i: (i, 0)),            # x row-tile
                pl.BlockSpec((dim_p, hid_p), lambda i: (0, 0), **wkw),  # w1t (resident)
                pl.BlockSpec((dim_p, hid_p), lambda i: (0, 0), **wkw),  # w3t (resident)
                pl.BlockSpec((hid_p, dim_p), lambda i: (0, 0), **wkw),  # w2t (resident)
                pl.BlockSpec((1, hid_p), lambda i: (0, 0), **wkw),      # rms weight
            ],
            out_specs=pl.BlockSpec((tm, dim_p), lambda i: (i, 0)),
            compiler_params=pltpu.CompilerParams(
                dimension_semantics=("parallel",),
                vmem_limit_bytes=vmem_limit),
            cost_estimate=cost,
        )
        return jax.block_until_ready(
            call(x2d, params["w1t"], params["w3t"], params["w2t"], params["rmsw"]))

    try:
        out2d = run(True)
    except Exception:
        # pipeline_mode=pl.Buffered(1) not supported by this jax build ->
        # fall back to default (double) buffering of the invariant weights.
        out2d = run(False)

    return out2d[:M, :dim].reshape(*lead_shape, dim)


def feed_forward_ref(x, w13, w2, rms_weight, norm_eps):
    """Pure-JAX f32 reference mirroring the PyTorch module exactly."""
    hp = jax.lax.Precision.HIGHEST

    def quant(v):
        s = 127.0 / jnp.maximum(jnp.max(jnp.abs(v), axis=-1, keepdims=True), 1e-5)
        return jnp.clip(jnp.round(v * s), -128.0, 127.0) / s

    x13 = jnp.dot(quant(x), w13.T, precision=hp)
    hidden = w2.shape[-1]
    x1, x3 = x13[..., :hidden], x13[..., hidden:]
    h = jnp.maximum(x1, 0.0) ** 2 * x3
    inner = h * jax.lax.rsqrt(jnp.mean(h * h, axis=-1, keepdims=True) + norm_eps) * rms_weight
    return jnp.dot(quant(inner), w2.T, precision=hp)


if __name__ == "__main__":
    norm_eps = 1e-5
    key = jax.random.PRNGKey(0)
    k_small, k_big = jax.random.split(key)

    def make_case(k, batch, seq, dim, hidden_dim, rms_ones):
        kx, k13, k2, kr = jax.random.split(k, 4)
        x = jax.random.normal(kx, (batch, seq, dim), dtype=jnp.float32)
        # PyTorch shapes: weight = (out_features, in_features).
        w13 = 0.02 * jax.random.normal(k13, (2 * hidden_dim, dim), dtype=jnp.float32)
        w2 = 0.02 * jax.random.normal(k2, (dim, hidden_dim), dtype=jnp.float32)
        if rms_ones:
            rmsw = jnp.ones((hidden_dim,), dtype=jnp.float32)   # RMSNorm init = ones
        else:
            rmsw = 1.0 + 0.1 * jax.random.normal(kr, (hidden_dim,), dtype=jnp.float32)
        return x, w13, w2, rmsw

    def bf16_ref_weights(params, dim, hidden):
        # The bf16-cast weights the kernel actually uses, back in PyTorch layout.
        w1 = jnp.transpose(params["w1t"][:dim, :hidden]).astype(jnp.float32)
        w3 = jnp.transpose(params["w3t"][:dim, :hidden]).astype(jnp.float32)
        w2b = jnp.transpose(params["w2t"][:hidden, :dim]).astype(jnp.float32)
        return jnp.concatenate([w1, w3], axis=0), w2b

    def run_case(k, batch, seq, dim, hidden_dim, rms_ones):
        x, w13, w2, rmsw = make_case(k, batch, seq, dim, hidden_dim, rms_ones)
        params = prepare_ffn_params(w13, w2, rmsw)        # one-time prep
        out = jax.block_until_ready(feed_forward_pallas(x, params, norm_eps))
        assert out.shape == (batch, seq, dim)
        # Compare against a reference run on the same bf16-cast weights the kernel
        # uses (isolates kernel scale-folding / accumulation order from the weight cast).
        w13_b, w2_b = bf16_ref_weights(params, dim, hidden_dim)
        ref_b = feed_forward_ref(x, w13_b, w2_b, rmsw, norm_eps)
        assert jnp.allclose(out, ref_b, atol=2e-2, rtol=2e-2), (
            float(jnp.max(jnp.abs(out - ref_b))))
        return x, w13, w2, rmsw, out

    # Small case (module-scale shapes); also check against the exact f32 reference.
    x, w13, w2, rmsw, out = run_case(k_small, 2, 8, 32, 64, rms_ones=True)
    ref = feed_forward_ref(x, w13, w2, rmsw, norm_eps)
    # bf16 weight cast in the kernel -> relaxed tolerance vs the exact f32 reference
    # (the activation fake-quant itself is exact).
    assert jnp.allclose(out, ref, atol=1e-2, rtol=5e-2), (
        float(jnp.max(jnp.abs(out - ref))))

    # Larger multi-tile case: M=300 (not a multiple of tm), hidden >= 2048.
    # Exercises the row grid, megacore split and the VMEM-derived row-tile size.
    run_case(k_big, 3, 100, 1024, 2048, rms_ones=False)

    print("KERNEL_OK")
</pallas_src>

<mosaic_0001>
module attributes {stable_mosaic.version = 11 : i64} {
  func.func @_ffn_kernel(%arg0: i32, %arg1: memref<16x128xf32, #tpu.memory_space<vmem>>, %arg2: memref<128x128xbf16, #tpu.memory_space<vmem>>, %arg3: memref<128x128xbf16, #tpu.memory_space<vmem>>, %arg4: memref<128x128xbf16, #tpu.memory_space<vmem>>, %arg5: memref<1x128xf32, #tpu.memory_space<vmem>>, %arg6: memref<16x128xf32, #tpu.memory_space<vmem>>) attributes {dimension_semantics = [#tpu.dimension_semantics<parallel>], iteration_bounds = array<i64: 1>, scalar_prefetch = 0 : i64, scratch_operands = 0 : i64, tpu.core_type = #tpu.core_type<tc>, window_params = [{transform_indices = @transform_0, window_bounds = array<i64: 16, 128>}, {pipeline_mode = #tpu.pipeline_mode<synchronous>, transform_indices = @transform_1, window_bounds = array<i64: 128, 128>}, {pipeline_mode = #tpu.pipeline_mode<synchronous>, transform_indices = @transform_2, window_bounds = array<i64: 128, 128>}, {pipeline_mode = #tpu.pipeline_mode<synchronous>, transform_indices = @transform_3, window_bounds = array<i64: 128, 128>}, {pipeline_mode = #tpu.pipeline_mode<synchronous>, transform_indices = @transform_4, window_bounds = array<i64: 1, 128>}, {transform_indices = @transform_5, window_bounds = array<i64: 16, 128>}]} {
    %c0 = arith.constant 0 : index
    %c0_0 = arith.constant 0 : index
    %0 = vector.load %arg5[%c0, %c0_0] : memref<1x128xf32, #tpu.memory_space<vmem>>, vector<1x128xf32>
    %c0_1 = arith.constant 0 : index
    %c0_2 = arith.constant 0 : index
    %1 = vector.load %arg2[%c0_1, %c0_2] : memref<128x128xbf16, #tpu.memory_space<vmem>>, vector<128x128xbf16>
    %c0_3 = arith.constant 0 : index
    %c0_4 = arith.constant 0 : index
    %2 = vector.load %arg3[%c0_3, %c0_4] : memref<128x128xbf16, #tpu.memory_space<vmem>>, vector<128x128xbf16>
    %c0_5 = arith.constant 0 : index
    %c0_6 = arith.constant 0 : index
    %3 = vector.load %arg4[%c0_5, %c0_6] : memref<128x128xbf16, #tpu.memory_space<vmem>>, vector<128x128xbf16>
    %c0_7 = arith.constant 0 : index
    %c0_8 = arith.constant 0 : index
    %4 = vector.load %arg1[%c0_7, %c0_8] : memref<16x128xf32, #tpu.memory_space<vmem>>, vector<8x128xf32>
    %5 = math.absf %4 : vector<8x128xf32>
    %cst = arith.constant dense<0xFF800000> : vector<8xf32>
    %6 = vector.multi_reduction <maximumf>, %5, %cst [1] : vector<8x128xf32> to vector<8xf32>
    %7 = vector.shape_cast %6 : vector<8xf32> to vector<8x1xf32>
    %cst_9 = arith.constant 9.99999974E-6 : f32
    %8 = vector.broadcast %cst_9 : f32 to vector<8x1xf32>
    %9 = arith.maximumf %7, %8 : vector<8x1xf32>
    %cst_10 = arith.constant 1.270000e+02 : f32
    %10 = vector.broadcast %cst_10 : f32 to vector<8x1xf32>
    %11 = arith.divf %10, %9 : vector<8x1xf32>
    %12 = vector.broadcast %11 : vector<8x1xf32> to vector<8x128xf32>
    %13 = arith.mulf %4, %12 : vector<8x128xf32>
    %14 = math.roundeven %13 : vector<8x128xf32>
    %cst_11 = arith.constant -1.280000e+02 : f32
    %cst_12 = arith.constant 1.270000e+02 : f32
    %15 = vector.broadcast %cst_11 : f32 to vector<8x128xf32>
    %16 = arith.maximumf %15, %14 : vector<8x128xf32>
    %17 = vector.broadcast %cst_12 : f32 to vector<8x128xf32>
    %18 = arith.minimumf %17, %16 : vector<8x128xf32>
    %19 = arith.truncf %18 : vector<8x128xf32> to vector<8x128xbf16>
    %cst_13 = arith.constant 0.00787401571 : f32
    %20 = vector.broadcast %cst_13 : f32 to vector<8x1xf32>
    %21 = arith.mulf %9, %20 : vector<8x1xf32>
    %cst_14 = arith.constant dense<0.000000e+00> : vector<8x128xf32>
    %22 = tpu.matmul %19, %1, %cst_14 {dimension_numbers = #tpu.dot_dimension_numbers<[1], [0], [0], [1], [0, 0, 1, 1], [], []>} : vector<8x128xbf16>, vector<128x128xbf16>, vector<8x128xf32> -> vector<8x128xf32>
    %cst_15 = arith.constant dense<0.000000e+00> : vector<8x128xf32>
    %23 = tpu.matmul %19, %2, %cst_15 {dimension_numbers = #tpu.dot_dimension_numbers<[1], [0], [0], [1], [0, 0, 1, 1], [], []>} : vector<8x128xbf16>, vector<128x128xbf16>, vector<8x128xf32> -> vector<8x128xf32>
    %cst_16 = arith.constant 0.000000e+00 : f32
    %24 = vector.broadcast %cst_16 : f32 to vector<8x128xf32>
    %25 = arith.maximumf %22, %24 : vector<8x128xf32>
    %26 = arith.mulf %25, %25 : vector<8x128xf32>
    %27 = arith.mulf %26, %23 : vector<8x128xf32>
    %28 = vector.broadcast %0 : vector<1x128xf32> to vector<8x128xf32>
    %29 = arith.mulf %27, %28 : vector<8x128xf32>
    %30 = arith.mulf %27, %27 : vector<8x128xf32>
    %cst_17 = arith.constant dense<0.000000e+00> : vector<8xf32>
    %31 = vector.multi_reduction <add>, %30, %cst_17 [1] : vector<8x128xf32> to vector<8xf32>
    %32 = vector.shape_cast %31 : vector<8xf32> to vector<8x1xf32>
    %33 = arith.mulf %21, %21 : vector<8x1xf32>
    %34 = arith.mulf %33, %21 : vector<8x1xf32>
    %35 = arith.mulf %34, %34 : vector<8x1xf32>
    %36 = arith.mulf %35, %32 : vector<8x1xf32>
    %cst_18 = arith.constant 1.562500e-02 : f32
    %37 = vector.broadcast %cst_18 : f32 to vector<8x1xf32>
    %38 = arith.mulf %36, %37 : vector<8x1xf32>
    %cst_19 = arith.constant 9.99999974E-6 : f32
    %39 = vector.broadcast %cst_19 : f32 to vector<8x1xf32>
    %40 = arith.addf %38, %39 : vector<8x1xf32>
    %41 = math.rsqrt %40 : vector<8x1xf32>
    %42 = arith.mulf %34, %41 : vector<8x1xf32>
    %43 = math.absf %29 : vector<8x128xf32>
    %cst_20 = arith.constant dense<0xFF800000> : vector<8xf32>
    %44 = vector.multi_reduction <maximumf>, %43, %cst_20 [1] : vector<8x128xf32> to vector<8xf32>
    %45 = vector.shape_cast %44 : vector<8xf32> to vector<8x1xf32>
    %46 = arith.mulf %42, %45 : vector<8x1xf32>
    %cst_21 = arith.constant 9.99999974E-6 : f32
    %47 = vector.broadcast %cst_21 : f32 to vector<8x1xf32>
    %48 = arith.maximumf %46, %47 : vector<8x1xf32>
    %cst_22 = arith.constant 1.270000e+02 : f32
    %49 = vector.broadcast %cst_22 : f32 to vector<8x1xf32>
    %50 = arith.divf %49, %48 : vector<8x1xf32>
    %51 = arith.mulf %42, %50 : vector<8x1xf32>
    %52 = vector.broadcast %51 : vector<8x1xf32> to vector<8x128xf32>
    %53 = arith.mulf %29, %52 : vector<8x128xf32>
    %54 = math.roundeven %53 : vector<8x128xf32>
    %cst_23 = arith.constant -1.280000e+02 : f32
    %cst_24 = arith.constant 1.270000e+02 : f32
    %55 = vector.broadcast %cst_23 : f32 to vector<8x128xf32>
    %56 = arith.maximumf %55, %54 : vector<8x128xf32>
    %57 = vector.broadcast %cst_24 : f32 to vector<8x128xf32>
    %58 = arith.minimumf %57, %56 : vector<8x128xf32>
    %59 = arith.truncf %58 : vector<8x128xf32> to vector<8x128xbf16>
    %cst_25 = arith.constant 0.00787401571 : f32
    %60 = vector.broadcast %cst_25 : f32 to vector<8x1xf32>
    %61 = arith.mulf %48, %60 : vector<8x1xf32>
    %cst_26 = arith.constant dense<0.000000e+00> : vector<8x128xf32>
    %62 = tpu.matmul %59, %3, %cst_26 {dimension_numbers = #tpu.dot_dimension_numbers<[1], [0], [0], [1], [0, 0, 1, 1], [], []>} : vector<8x128xbf16>, vector<128x128xbf16>, vector<8x128xf32> -> vector<8x128xf32>
    %63 = vector.broadcast %61 : vector<8x1xf32> to vector<8x128xf32>
    %64 = arith.mulf %62, %63 : vector<8x128xf32>
    %c0_27 = arith.constant 0 : index
    %c0_28 = arith.constant 0 : index
    %65 = vector.load %arg6[%c0_27, %c0_28] : memref<16x128xf32, #tpu.memory_space<vmem>>, vector<8x128xf32>
    tpu.vector_store %arg6[%c0_27, %c0_28], %64 {strides = array<i32>} : memref<16x128xf32, #tpu.memory_space<vmem>>, vector<8x128xf32>,
    %c8 = arith.constant 8 : index
    %c0_29 = arith.constant 0 : index
    %66 = vector.load %arg1[%c8, %c0_29] : memref<16x128xf32, #tpu.memory_space<vmem>>, vector<8x128xf32>
    %67 = math.absf %66 : vector<8x128xf32>
    %cst_30 = arith.constant dense<0xFF800000> : vector<8xf32>
    %68 = vector.multi_reduction <maximumf>, %67, %cst_30 [1] : vector<8x128xf32> to vector<8xf32>
    %69 = vector.shape_cast %68 : vector<8xf32> to vector<8x1xf32>
    %cst_31 = arith.constant 9.99999974E-6 : f32
    %70 = vector.broadcast %cst_31 : f32 to vector<8x1xf32>
    %71 = arith.maximumf %69, %70 : vector<8x1xf32>
    %cst_32 = arith.constant 1.270000e+02 : f32
    %72 = vector.broadcast %cst_32 : f32 to vector<8x1xf32>
    %73 = arith.divf %72, %71 : vector<8x1xf32>
    %74 = vector.broadcast %73 : vector<8x1xf32> to vector<8x128xf32>
    %75 = arith.mulf %66, %74 : vector<8x128xf32>
    %76 = math.roundeven %75 : vector<8x128xf32>
    %cst_33 = arith.constant -1.280000e+02 : f32
    %cst_34 = arith.constant 1.270000e+02 : f32
    %77 = vector.broadcast %cst_33 : f32 to vector<8x128xf32>
    %78 = arith.maximumf %77, %76 : vector<8x128xf32>
    %79 = vector.broadcast %cst_34 : f32 to vector<8x128xf32>
    %80 = arith.minimumf %79, %78 : vector<8x128xf32>
    %81 = arith.truncf %80 : vector<8x128xf32> to vector<8x128xbf16>
    %cst_35 = arith.constant 0.00787401571 : f32
    %82 = vector.broadcast %cst_35 : f32 to vector<8x1xf32>
    %83 = arith.mulf %71, %82 : vector<8x1xf32>
    %cst_36 = arith.constant dense<0.000000e+00> : vector<8x128xf32>
    %84 = tpu.matmul %81, %1, %cst_36 {dimension_numbers = #tpu.dot_dimension_numbers<[1], [0], [0], [1], [0, 0, 1, 1], [], []>} : vector<8x128xbf16>, vector<128x128xbf16>, vector<8x128xf32> -> vector<8x128xf32>
    %cst_37 = arith.constant dense<0.000000e+00> : vector<8x128xf32>
    %85 = tpu.matmul %81, %2, %cst_37 {dimension_numbers = #tpu.dot_dimension_numbers<[1], [0], [0], [1], [0, 0, 1, 1], [], []>} : vector<8x128xbf16>, vector<128x128xbf16>, vector<8x128xf32> -> vector<8x128xf32>
    %cst_38 = arith.constant 0.000000e+00 : f32
    %86 = vector.broadcast %cst_38 : f32 to vector<8x128xf32>
    %87 = arith.maximumf %84, %86 : vector<8x128xf32>
    %88 = arith.mulf %87, %87 : vector<8x128xf32>
    %89 = arith.mulf %88, %85 : vector<8x128xf32>
    %90 = vector.broadcast %0 : vector<1x128xf32> to vector<8x128xf32>
    %91 = arith.mulf %89, %90 : vector<8x128xf32>
    %92 = arith.mulf %89, %89 : vector<8x128xf32>
    %cst_39 = arith.constant dense<0.000000e+00> : vector<8xf32>
    %93 = vector.multi_reduction <add>, %92, %cst_39 [1] : vector<8x128xf32> to vector<8xf32>
    %94 = vector.shape_cast %93 : vector<8xf32> to vector<8x1xf32>
    %95 = arith.mulf %83, %83 : vector<8x1xf32>
    %96 = arith.mulf %95, %83 : vector<8x1xf32>
    %97 = arith.mulf %96, %96 : vector<8x1xf32>
    %98 = arith.mulf %97, %94 : vector<8x1xf32>
    %cst_40 = arith.constant 1.562500e-02 : f32
    %99 = vector.broadcast %cst_40 : f32 to vector<8x1xf32>
    %100 = arith.mulf %98, %99 : vector<8x1xf32>
    %cst_41 = arith.constant 9.99999974E-6 : f32
    %101 = vector.broadcast %cst_41 : f32 to vector<8x1xf32>
    %102 = arith.addf %100, %101 : vector<8x1xf32>
    %103 = math.rsqrt %102 : vector<8x1xf32>
    %104 = arith.mulf %96, %103 : vector<8x1xf32>
    %105 = math.absf %91 : vector<8x128xf32>
    %cst_42 = arith.constant dense<0xFF800000> : vector<8xf32>
    %106 = vector.multi_reduction <maximumf>, %105, %cst_42 [1] : vector<8x128xf32> to vector<8xf32>
    %107 = vector.shape_cast %106 : vector<8xf32> to vector<8x1xf32>
    %108 = arith.mulf %104, %107 : vector<8x1xf32>
    %cst_43 = arith.constant 9.99999974E-6 : f32
    %109 = vector.broadcast %cst_43 : f32 to vector<8x1xf32>
    %110 = arith.maximumf %108, %109 : vector<8x1xf32>
    %cst_44 = arith.constant 1.270000e+02 : f32
    %111 = vector.broadcast %cst_44 : f32 to vector<8x1xf32>
    %112 = arith.divf %111, %110 : vector<8x1xf32>
    %113 = arith.mulf %104, %112 : vector<8x1xf32>
    %114 = vector.broadcast %113 : vector<8x1xf32> to vector<8x128xf32>
    %115 = arith.mulf %91, %114 : vector<8x128xf32>
    %116 = math.roundeven %115 : vector<8x128xf32>
    %cst_45 = arith.constant -1.280000e+02 : f32
    %cst_46 = arith.constant 1.270000e+02 : f32
    %117 = vector.broadcast %cst_45 : f32 to vector<8x128xf32>
    %118 = arith.maximumf %117, %116 : vector<8x128xf32>
    %119 = vector.broadcast %cst_46 : f32 to vector<8x128xf32>
    %120 = arith.minimumf %119, %118 : vector<8x128xf32>
    %121 = arith.truncf %120 : vector<8x128xf32> to vector<8x128xbf16>
    %cst_47 = arith.constant 0.00787401571 : f32
    %122 = vector.broadcast %cst_47 : f32 to vector<8x1xf32>
    %123 = arith.mulf %110, %122 : vector<8x1xf32>
    %cst_48 = arith.constant dense<0.000000e+00> : vector<8x128xf32>
    %124 = tpu.matmul %121, %3, %cst_48 {dimension_numbers = #tpu.dot_dimension_numbers<[1], [0], [0], [1], [0, 0, 1, 1], [], []>} : vector<8x128xbf16>, vector<128x128xbf16>, vector<8x128xf32> -> vector<8x128xf32>
    %125 = vector.broadcast %123 : vector<8x1xf32> to vector<8x128xf32>
    %126 = arith.mulf %124, %125 : vector<8x128xf32>
    %c8_49 = arith.constant 8 : index
    %c0_50 = arith.constant 0 : index
    %127 = vector.load %arg6[%c8_49, %c0_50] : memref<16x128xf32, #tpu.memory_space<vmem>>, vector<8x128xf32>
    tpu.vector_store %arg6[%c8_49, %c0_50], %126 {strides = array<i32>} : memref<16x128xf32, #tpu.memory_space<vmem>>, vector<8x128xf32>,
    return
  }
  func.func @transform_0(%arg0: i32) -> (i32, i32) {
    %c0_i32 = arith.constant 0 : i32
    %c0_i32_0 = arith.constant 0 : i32
    return %arg0, %c0_i32 : i32, i32
  }
  func.func @transform_1(%arg0: i32) -> (i32, i32) {
    %c0_i32 = arith.constant 0 : i32
    %c0_i32_0 = arith.constant 0 : i32
    %c0_i32_1 = arith.constant 0 : i32
    return %c0_i32, %c0_i32_0 : i32, i32
  }
  func.func @transform_2(%arg0: i32) -> (i32, i32) {
    %c0_i32 = arith.constant 0 : i32
    %c0_i32_0 = arith.constant 0 : i32
    %c0_i32_1 = arith.constant 0 : i32
    return %c0_i32, %c0_i32_0 : i32, i32
  }
  func.func @transform_3(%arg0: i32) -> (i32, i32) {
    %c0_i32 = arith.constant 0 : i32
    %c0_i32_0 = arith.constant 0 : i32
    %c0_i32_1 = arith.constant 0 : i32
    return %c0_i32, %c0_i32_0 : i32, i32
  }
  func.func @transform_4(%arg0: i32) -> (i32, i32) {
    %c0_i32 = arith.constant 0 : i32
    %c0_i32_0 = arith.constant 0 : i32
    %c0_i32_1 = arith.constant 0 : i32
    return %c0_i32, %c0_i32_0 : i32, i32
  }
  func.func @transform_5(%arg0: i32) -> (i32, i32) {
    %c0_i32 = arith.constant 0 : i32
    %c0_i32_0 = arith.constant 0 : i32
    return %arg0, %c0_i32 : i32, i32
  }
}

module attributes {stable_mosaic.version = 11 : i64} {
  func.func @_ffn_kernel(%arg0: i32, %arg1: memref<16x128xf32, #tpu.memory_space<vmem>>, %arg2: memref<128x128xbf16, #tpu.memory_space<vmem>>, %arg3: memref<128x128xbf16, #tpu.memory_space<vmem>>, %arg4: memref<128x128xbf16, #tpu.memory_space<vmem>>, %arg5: memref<1x128xf32, #tpu.memory_space<vmem>>, %arg6: memref<16x128xf32, #tpu.memory_space<vmem>>) attributes {dimension_semantics = [#tpu.dimension_semantics<parallel>], iteration_bounds = array<i64: 1>, scalar_prefetch = 0 : i64, scratch_operands = 0 : i64, tpu.core_type = #tpu.core_type<tc>, window_params = [{transform_indices = @transform_0, window_bounds = array<i64: 16, 128>}, {pipeline_mode = #tpu.pipeline_mode<synchronous>, transform_indices = @transform_1, window_bounds = array<i64: 128, 128>}, {pipeline_mode = #tpu.pipeline_mode<synchronous>, transform_indices = @transform_2, window_bounds = array<i64: 128, 128>}, {pipeline_mode = #tpu.pipeline_mode<synchronous>, transform_indices = @transform_3, window_bounds = array<i64: 128, 128>}, {pipeline_mode = #tpu.pipeline_mode<synchronous>, transform_indices = @transform_4, window_bounds = array<i64: 1, 128>}, {transform_indices = @transform_5, window_bounds = array<i64: 16, 128>}]} {
    %c0 = arith.constant 0 : index
    %c0_0 = arith.constant 0 : index
    %0 = vector.load %arg5[%c0, %c0_0] : memref<1x128xf32, #tpu.memory_space<vmem>>, vector<1x128xf32>
    %c0_1 = arith.constant 0 : index
    %c0_2 = arith.constant 0 : index
    %1 = vector.load %arg2[%c0_1, %c0_2] : memref<128x128xbf16, #tpu.memory_space<vmem>>, vector<128x128xbf16>
    %c0_3 = arith.constant 0 : index
    %c0_4 = arith.constant 0 : index
    %2 = vector.load %arg3[%c0_3, %c0_4] : memref<128x128xbf16, #tpu.memory_space<vmem>>, vector<128x128xbf16>
    %c0_5 = arith.constant 0 : index
    %c0_6 = arith.constant 0 : index
    %3 = vector.load %arg4[%c0_5, %c0_6] : memref<128x128xbf16, #tpu.memory_space<vmem>>, vector<128x128xbf16>
    %c0_7 = arith.constant 0 : index
    %c0_8 = arith.constant 0 : index
    %4 = vector.load %arg1[%c0_7, %c0_8] : memref<16x128xf32, #tpu.memory_space<vmem>>, vector<8x128xf32>
    %5 = math.absf %4 : vector<8x128xf32>
    %cst = arith.constant dense<0xFF800000> : vector<8xf32>
    %6 = vector.multi_reduction <maximumf>, %5, %cst [1] : vector<8x128xf32> to vector<8xf32>
    %7 = vector.shape_cast %6 : vector<8xf32> to vector<8x1xf32>
    %cst_9 = arith.constant 9.99999974E-6 : f32
    %8 = vector.broadcast %cst_9 : f32 to vector<8x1xf32>
    %9 = arith.maximumf %7, %8 : vector<8x1xf32>
    %cst_10 = arith.constant 1.270000e+02 : f32
    %10 = vector.broadcast %cst_10 : f32 to vector<8x1xf32>
    %11 = arith.divf %10, %9 : vector<8x1xf32>
    %12 = vector.broadcast %11 : vector<8x1xf32> to vector<8x128xf32>
    %13 = arith.mulf %4, %12 : vector<8x128xf32>
    %14 = math.roundeven %13 : vector<8x128xf32>
    %cst_11 = arith.constant -1.280000e+02 : f32
    %cst_12 = arith.constant 1.270000e+02 : f32
    %15 = vector.broadcast %cst_11 : f32 to vector<8x128xf32>
    %16 = arith.maximumf %15, %14 : vector<8x128xf32>
    %17 = vector.broadcast %cst_12 : f32 to vector<8x128xf32>
    %18 = arith.minimumf %17, %16 : vector<8x128xf32>
    %19 = arith.truncf %18 : vector<8x128xf32> to vector<8x128xbf16>
    %cst_13 = arith.constant 0.00787401571 : f32
    %20 = vector.broadcast %cst_13 : f32 to vector<8x1xf32>
    %21 = arith.mulf %9, %20 : vector<8x1xf32>
    %cst_14 = arith.constant dense<0.000000e+00> : vector<8x128xf32>
    %22 = tpu.matmul %19, %1, %cst_14 {dimension_numbers = #tpu.dot_dimension_numbers<[1], [0], [0], [1], [0, 0, 1, 1], [], []>} : vector<8x128xbf16>, vector<128x128xbf16>, vector<8x128xf32> -> vector<8x128xf32>
    %cst_15 = arith.constant dense<0.000000e+00> : vector<8x128xf32>
    %23 = tpu.matmul %19, %2, %cst_15 {dimension_numbers = #tpu.dot_dimension_numbers<[1], [0], [0], [1], [0, 0, 1, 1], [], []>} : vector<8x128xbf16>, vector<128x128xbf16>, vector<8x128xf32> -> vector<8x128xf32>
    %cst_16 = arith.constant 0.000000e+00 : f32
    %24 = vector.broadcast %cst_16 : f32 to vector<8x128xf32>
    %25 = arith.maximumf %22, %24 : vector<8x128xf32>
    %26 = arith.mulf %25, %25 : vector<8x128xf32>
    %27 = arith.mulf %26, %23 : vector<8x128xf32>
    %28 = vector.broadcast %0 : vector<1x128xf32> to vector<8x128xf32>
    %29 = arith.mulf %27, %28 : vector<8x128xf32>
    %30 = arith.mulf %27, %27 : vector<8x128xf32>
    %cst_17 = arith.constant dense<0.000000e+00> : vector<8xf32>
    %31 = vector.multi_reduction <add>, %30, %cst_17 [1] : vector<8x128xf32> to vector<8xf32>
    %32 = vector.shape_cast %31 : vector<8xf32> to vector<8x1xf32>
    %33 = arith.mulf %21, %21 : vector<8x1xf32>
    %34 = arith.mulf %33, %21 : vector<8x1xf32>
    %35 = arith.mulf %34, %34 : vector<8x1xf32>
    %36 = arith.mulf %35, %32 : vector<8x1xf32>
    %cst_18 = arith.constant 1.562500e-02 : f32
    %37 = vector.broadcast %cst_18 : f32 to vector<8x1xf32>
    %38 = arith.mulf %36, %37 : vector<8x1xf32>
    %cst_19 = arith.constant 9.99999974E-6 : f32
    %39 = vector.broadcast %cst_19 : f32 to vector<8x1xf32>
    %40 = arith.addf %38, %39 : vector<8x1xf32>
    %41 = math.rsqrt %40 : vector<8x1xf32>
    %42 = arith.mulf %34, %41 : vector<8x1xf32>
    %43 = math.absf %29 : vector<8x128xf32>
    %cst_20 = arith.constant dense<0xFF800000> : vector<8xf32>
    %44 = vector.multi_reduction <maximumf>, %43, %cst_20 [1] : vector<8x128xf32> to vector<8xf32>
    %45 = vector.shape_cast %44 : vector<8xf32> to vector<8x1xf32>
    %46 = arith.mulf %42, %45 : vector<8x1xf32>
    %cst_21 = arith.constant 9.99999974E-6 : f32
    %47 = vector.broadcast %cst_21 : f32 to vector<8x1xf32>
    %48 = arith.maximumf %46, %47 : vector<8x1xf32>
    %cst_22 = arith.constant 1.270000e+02 : f32
    %49 = vector.broadcast %cst_22 : f32 to vector<8x1xf32>
    %50 = arith.divf %49, %48 : vector<8x1xf32>
    %51 = arith.mulf %42, %50 : vector<8x1xf32>
    %52 = vector.broadcast %51 : vector<8x1xf32> to vector<8x128xf32>
    %53 = arith.mulf %29, %52 : vector<8x128xf32>
    %54 = math.roundeven %53 : vector<8x128xf32>
    %cst_23 = arith.constant -1.280000e+02 : f32
    %cst_24 = arith.constant 1.270000e+02 : f32
    %55 = vector.broadcast %cst_23 : f32 to vector<8x128xf32>
    %56 = arith.maximumf %55, %54 : vector<8x128xf32>
    %57 = vector.broadcast %cst_24 : f32 to vector<8x128xf32>
    %58 = arith.minimumf %57, %56 : vector<8x128xf32>
    %59 = arith.truncf %58 : vector<8x128xf32> to vector<8x128xbf16>
    %cst_25 = arith.constant 0.00787401571 : f32
    %60 = vector.broadcast %cst_25 : f32 to vector<8x1xf32>
    %61 = arith.mulf %48, %60 : vector<8x1xf32>
    %cst_26 = arith.constant dense<0.000000e+00> : vector<8x128xf32>
    %62 = tpu.matmul %59, %3, %cst_26 {dimension_numbers = #tpu.dot_dimension_numbers<[1], [0], [0], [1], [0, 0, 1, 1], [], []>} : vector<8x128xbf16>, vector<128x128xbf16>, vector<8x128xf32> -> vector<8x128xf32>
    %63 = vector.broadcast %61 : vector<8x1xf32> to vector<8x128xf32>
    %64 = arith.mulf %62, %63 : vector<8x128xf32>
    %c0_27 = arith.constant 0 : index
    %c0_28 = arith.constant 0 : index
    %65 = vector.load %arg6[%c0_27, %c0_28] : memref<16x128xf32, #tpu.memory_space<vmem>>, vector<8x128xf32>
    tpu.vector_store %arg6[%c0_27, %c0_28], %64 {strides = array<i32>} : memref<16x128xf32, #tpu.memory_space<vmem>>, vector<8x128xf32>,
    %c8 = arith.constant 8 : index
    %c0_29 = arith.constant 0 : index
    %66 = vector.load %arg1[%c8, %c0_29] : memref<16x128xf32, #tpu.memory_space<vmem>>, vector<8x128xf32>
    %67 = math.absf %66 : vector<8x128xf32>
    %cst_30 = arith.constant dense<0xFF800000> : vector<8xf32>
    %68 = vector.multi_reduction <maximumf>, %67, %cst_30 [1] : vector<8x128xf32> to vector<8xf32>
    %69 = vector.shape_cast %68 : vector<8xf32> to vector<8x1xf32>
    %cst_31 = arith.constant 9.99999974E-6 : f32
    %70 = vector.broadcast %cst_31 : f32 to vector<8x1xf32>
    %71 = arith.maximumf %69, %70 : vector<8x1xf32>
    %cst_32 = arith.constant 1.270000e+02 : f32
    %72 = vector.broadcast %cst_32 : f32 to vector<8x1xf32>
    %73 = arith.divf %72, %71 : vector<8x1xf32>
    %74 = vector.broadcast %73 : vector<8x1xf32> to vector<8x128xf32>
    %75 = arith.mulf %66, %74 : vector<8x128xf32>
    %76 = math.roundeven %75 : vector<8x128xf32>
    %cst_33 = arith.constant -1.280000e+02 : f32
    %cst_34 = arith.constant 1.270000e+02 : f32
    %77 = vector.broadcast %cst_33 : f32 to vector<8x128xf32>
    %78 = arith.maximumf %77, %76 : vector<8x128xf32>
    %79 = vector.broadcast %cst_34 : f32 to vector<8x128xf32>
    %80 = arith.minimumf %79, %78 : vector<8x128xf32>
    %81 = arith.truncf %80 : vector<8x128xf32> to vector<8x128xbf16>
    %cst_35 = arith.constant 0.00787401571 : f32
    %82 = vector.broadcast %cst_35 : f32 to vector<8x1xf32>
    %83 = arith.mulf %71, %82 : vector<8x1xf32>
    %cst_36 = arith.constant dense<0.000000e+00> : vector<8x128xf32>
    %84 = tpu.matmul %81, %1, %cst_36 {dimension_numbers = #tpu.dot_dimension_numbers<[1], [0], [0], [1], [0, 0, 1, 1], [], []>} : vector<8x128xbf16>, vector<128x128xbf16>, vector<8x128xf32> -> vector<8x128xf32>
    %cst_37 = arith.constant dense<0.000000e+00> : vector<8x128xf32>
    %85 = tpu.matmul %81, %2, %cst_37 {dimension_numbers = #tpu.dot_dimension_numbers<[1], [0], [0], [1], [0, 0, 1, 1], [], []>} : vector<8x128xbf16>, vector<128x128xbf16>, vector<8x128xf32> -> vector<8x128xf32>
    %cst_38 = arith.constant 0.000000e+00 : f32
    %86 = vector.broadcast %cst_38 : f32 to vector<8x128xf32>
    %87 = arith.maximumf %84, %86 : vector<8x128xf32>
    %88 = arith.mulf %87, %87 : vector<8x128xf32>
    %89 = arith.mulf %88, %85 : vector<8x128xf32>
    %90 = vector.broadcast %0 : vector<1x128xf32> to vector<8x128xf32>
    %91 = arith.mulf %89, %90 : vector<8x128xf32>
    %92 = arith.mulf %89, %89 : vector<8x128xf32>
    %cst_39 = arith.constant dense<0.000000e+00> : vector<8xf32>
    %93 = vector.multi_reduction <add>, %92, %cst_39 [1] : vector<8x128xf32> to vector<8xf32>
    %94 = vector.shape_cast %93 : vector<8xf32> to vector<8x1xf32>
    %95 = arith.mulf %83, %83 : vector<8x1xf32>
    %96 = arith.mulf %95, %83 : vector<8x1xf32>
    %97 = arith.mulf %96, %96 : vector<8x1xf32>
    %98 = arith.mulf %97, %94 : vector<8x1xf32>
    %cst_40 = arith.constant 1.562500e-02 : f32
    %99 = vector.broadcast %cst_40 : f32 to vector<8x1xf32>
    %100 = arith.mulf %98, %99 : vector<8x1xf32>
    %cst_41 = arith.constant 9.99999974E-6 : f32
    %101 = vector.broadcast %cst_41 : f32 to vector<8x1xf32>
    %102 = arith.addf %100, %101 : vector<8x1xf32>
    %103 = math.rsqrt %102 : vector<8x1xf32>
    %104 = arith.mulf %96, %103 : vector<8x1xf32>
    %105 = math.absf %91 : vector<8x128xf32>
    %cst_42 = arith.constant dense<0xFF800000> : vector<8xf32>
    %106 = vector.multi_reduction <maximumf>, %105, %cst_42 [1] : vector<8x128xf32> to vector<8xf32>
    %107 = vector.shape_cast %106 : vector<8xf32> to vector<8x1xf32>
    %108 = arith.mulf %104, %107 : vector<8x1xf32>
    %cst_43 = arith.constant 9.99999974E-6 : f32
    %109 = vector.broadcast %cst_43 : f32 to vector<8x1xf32>
    %110 = arith.maximumf %108, %109 : vector<8x1xf32>
    %cst_44 = arith.constant 1.270000e+02 : f32
    %111 = vector.broadcast %cst_44 : f32 to vector<8x1xf32>
    %112 = arith.divf %111, %110 : vector<8x1xf32>
    %113 = arith.mulf %104, %112 : vector<8x1xf32>
    %114 = vector.broadcast %113 : vector<8x1xf32> to vector<8x128xf32>
    %115 = arith.mulf %91, %114 : vector<8x128xf32>
    %116 = math.roundeven %115 : vector<8x128xf32>
    %cst_45 = arith.constant -1.280000e+02 : f32
    %cst_46 = arith.constant 1.270000e+02 : f32
    %117 = vector.broadcast %cst_45 : f32 to vector<8x128xf32>
    %118 = arith.maximumf %117, %116 : vector<8x128xf32>
    %119 = vector.broadcast %cst_46 : f32 to vector<8x128xf32>
    %120 = arith.minimumf %119, %118 : vector<8x128xf32>
    %121 = arith.truncf %120 : vector<8x128xf32> to vector<8x128xbf16>
    %cst_47 = arith.constant 0.00787401571 : f32
    %122 = vector.broadcast %cst_47 : f32 to vector<8x1xf32>
    %123 = arith.mulf %110, %122 : vector<8x1xf32>
    %cst_48 = arith.constant dense<0.000000e+00> : vector<8x128xf32>
    %124 = tpu.matmul %121, %3, %cst_48 {dimension_numbers = #tpu.dot_dimension_numbers<[1], [0], [0], [1], [0, 0, 1, 1], [], []>} : vector<8x128xbf16>, vector<128x128xbf16>, vector<8x128xf32> -> vector<8x128xf32>
    %125 = vector.broadcast %123 : vector<8x1xf32> to vector<8x128xf32>
    %126 = arith.mulf %124, %125 : vector<8x128xf32>
    %c8_49 = arith.constant 8 : index
    %c0_50 = arith.constant 0 : index
    %127 = vector.load %arg6[%c8_49, %c0_50] : memref<16x128xf32, #tpu.memory_space<vmem>>, vector<8x128xf32>
    tpu.vector_store %arg6[%c8_49, %c0_50], %126 {strides = array<i32>} : memref<16x128xf32, #tpu.memory_space<vmem>>, vector<8x128xf32>,
    return
  }
  func.func @transform_0(%arg0: i32) -> (i32, i32) {
    %c0_i32 = arith.constant 0 : i32
    %c0_i32_0 = arith.constant 0 : i32
    return %arg0, %c0_i32 : i32, i32
  }
  func.func @transform_1(%arg0: i32) -> (i32, i32) {
    %c0_i32 = arith.constant 0 : i32
    %c0_i32_0 = arith.constant 0 : i32
    %c0_i32_1 = arith.constant 0 : i32
    return %c0_i32, %c0_i32_0 : i32, i32
  }
  func.func @transform_2(%arg0: i32) -> (i32, i32) {
    %c0_i32 = arith.constant 0 : i32
    %c0_i32_0 = arith.constant 0 : i32
    %c0_i32_1 = arith.constant 0 : i32
    return %c0_i32, %c0_i32_0 : i32, i32
  }
  func.func @transform_3(%arg0: i32) -> (i32, i32) {
    %c0_i32 = arith.constant 0 : i32
    %c0_i32_0 = arith.constant 0 : i32
    %c0_i32_1 = arith.constant 0 : i32
    return %c0_i32, %c0_i32_0 : i32, i32
  }
  func.func @transform_4(%arg0: i32) -> (i32, i32) {
    %c0_i32 = arith.constant 0 : i32
    %c0_i32_0 = arith.constant 0 : i32
    %c0_i32_1 = arith.constant 0 : i32
    return %c0_i32, %c0_i32_0 : i32, i32
  }
  func.func @transform_5(%arg0: i32) -> (i32, i32) {
    %c0_i32 = arith.constant 0 : i32
    %c0_i32_0 = arith.constant 0 : i32
    return %arg0, %c0_i32 : i32, i32
  }
}

</mosaic_0001>

<bundles_post_ra>
// kernel: tpu_custom_call.1
= control target key start
LH: loop header
LB: loop body
LE: loop exit
PB: predicated region body
PF: predicated region fallthrough
CT: control target
= control target key end

     0   :  { %10 = vsyncpa [#allocation3], 0  ;;  %s942_s0 = inlined_call_operand.hbm [shape: f32[16,128], index: 0, kind: input, shape index: {}]   ;;  %s943_s1 = inlined_call_operand.hbm [shape: bf16[128,128], index: 1, kind: input, shape index: {}]   ;;  %s944_s2 = inlined_call_operand.hbm [shape: bf16[128,128], index: 2, kind: input, shape index: {}]   ;;  %s945_s3 = inlined_call_operand.hbm [shape: bf16[128,128], index: 3, kind: input, shape index: {}]   ;;  %s946_s4 = inlined_call_operand.vmem [shape: f32[1,128], index: 4, kind: input, shape index: {}]   ;;  %s947_s5 = inlined_call_operand.hbm [shape: f32[16,128], index: 5, kind: output, shape index: {}]  }
   0x1   :  { %11 = vsyncpa [#allocation6], 0 }
   0x2   :  { %12 = vsyncpa [#allocation9], 0  ;;  %s31_s20 = sshll.u32 %s943_s1, 4  ;;  %s32_s20 = int_to_ptr.hbm [resolvable:$true] %s31_s20 }
   0x3   :  { %13 = vsyncpa [#allocation4], 0  ;;  %s839_s21 = smov [#allocation5]   ;;  %s18_s25 = sshll.u32 %s942_s0, 4  ;;  %s19_s25 = int_to_ptr.hbm [resolvable:$true] %s18_s25 }
   0x4   :  { %s33_s22 = sshll.u32 %s839_s21, 4  ;;  %s840_s26 = smov 64   ;;  %s34_s22 = int_to_ptr.vmem [resolvable:$true] %s33_s22 }
   0x5   :  { %s841_s27 = smov 4   ;;  %s842_s28 = smov [#allocation2]  }
   0x6   :  { %39 = dma.hbm_to_vmem [thread:$0]  %s32_s20, 1024, %s34_s22, [#allocation6], %s840_s26, %s840_s26, %s841_s27  }
   0x7   :  { %s20_s29 = sshll.u32 %s842_s28, 4  ;;  %s843_s30 = smov 128   ;;  %s21_s29 = int_to_ptr.vmem [resolvable:$true] %s20_s29 }
   0x8   :  { %s844_s6 = smov 8   ;;  %s44_s8 = sshll.u32 %s944_s2, 4  ;;  %s45_s8 = int_to_ptr.hbm [resolvable:$true] %s44_s8 }
   0x9   :  { %26 = dma.hbm_to_vmem [thread:$0]  %s19_s25, 256, %s21_s29, [#allocation3], %s843_s30, %s843_s30, %s844_s6  }
   0xa   :  { %s845_s9 = smov [#allocation7]   ;;  %s57_s12 = sshll.u32 %s945_s3, 4  ;;  %s58_s12 = int_to_ptr.hbm [resolvable:$true] %s57_s12 }
   0xb   :  { %s46_s0 = sshll.u32 %s845_s9, 4  ;;  %s846_s13 = smov [#allocation8]   ;;  %s47_s0 = int_to_ptr.vmem [resolvable:$true] %s46_s0 }
   0xc   :  { %52 = dma.hbm_to_vmem [thread:$0]  %s45_s8, 1024, %s47_s0, [#allocation6], %s840_s26, %s840_s26, %s841_s27  }
   0xd   :  { %s59_s14 = sshll.u32 %s846_s13, 4  ;;  %s60_s14 = int_to_ptr.vmem [resolvable:$true] %s59_s14 }
   0xe   :  { %65 = dma.hbm_to_vmem [thread:$0]  %s58_s12, 1024, %s60_s14, [#allocation9], %s840_s26, %s840_s26, %s841_s27  }
   0xf   :  { %831 = dma.done.wait [#allocation3], 256  }
  0x10   :  { %832 = vsyncadd [#allocation3], 4294967040 }
  0x11   :  { %833 = dma.done.wait [#allocation6], 2048  }
  0x12   :  { %834 = vsyncadd [#allocation6], 4294965248 }
  0x13   :  { %835 = dma.done.wait [#allocation9], 1024  }
  0x14   :  { %836 = vsyncadd [#allocation9], 4294966272  ;;  %v893_v0 = vld [vmem:[#allocation2] sm:$0xff]  ;;  %v640_v1 = vld [vmem:[#allocation5 + $0x38] sm:$0xff]  ;;  %s522_s18 = sshll.u32 %s947_s5, 4  ;;  %s523_s18 = int_to_ptr.hbm [resolvable:$true] %s522_s18 }
  0x15   :  { %v134_v2 = vand.u32 2147483647, %v893_v0  ;;  %207 = vmatpush.bf16.msra.mxu0 %v640_v1  ;;  %v639_v3 = vld [vmem:[#allocation5 + $0x30] sm:$0xff]  ;;  %424 = vmatpush.bf16.msra.mxu3 %v640_v1  ;;  %v896_v4 = vld [vmem:[#allocation2 + $0x8] sm:$0xff]  ;;  %v638_v6 = vld [vmem:[#allocation5 + $0x28] sm:$0xff] }
  0x16   :  { %v399_v5 = vand.u32 2147483647, %v896_v4  ;;  %v637_v7 = vld [vmem:[#allocation5 + $0x20] sm:$0xff]  ;;  %v648_v8 = vld [vmem:[#allocation7 + $0x38] sm:$0xff]  ;;  %v647_v10 = vld [vmem:[#allocation7 + $0x30] sm:$0xff] }
  0x17   :  { %135 = vmax.xlane.f32.xlu0 %v134_v2  ;;  %268 = vmatpush.bf16.msra.mxu1 %v648_v8  ;;  %v636_v9 = vld [vmem:[#allocation5 + $0x18] sm:$0xff]  ;;  %v635_v11 = vld [vmem:[#allocation5 + $0x10] sm:$0xff]  ;;  %v646_v12 = vld [vmem:[#allocation7 + $0x28] sm:$0xff] }
  0x18   :  { %v634_v13 = vld [vmem:[#allocation5 + $0x8] sm:$0xff]  ;;  %v645_v14 = vld [vmem:[#allocation7 + $0x20] sm:$0xff]  ;;  %v644_v16 = vld [vmem:[#allocation7 + $0x18] sm:$0xff] }
  0x19   :  { %208 = vmatpush.bf16.msra.mxu0 %v639_v3  ;;  %425 = vmatpush.bf16.msra.mxu3 %v639_v3  ;;  %v633_v15 = vld [vmem:[#allocation5] sm:$0xff]  ;;  %v643_v17 = vld [vmem:[#allocation7 + $0x10] sm:$0xff]  ;;  %v642_v18 = vld [vmem:[#allocation7 + $0x8] sm:$0xff] }
  0x1a   :  { %v641_v20 = vld [vmem:[#allocation7] sm:$0xff] }
  0x1b   :  { %269 = vmatpush.bf16.msra.mxu1 %v647_v10 }
  0x1d   :  { %209 = vmatpush.bf16.msra.mxu0 %v638_v6  ;;  %426 = vmatpush.bf16.msra.mxu3 %v638_v6 }
  0x1f   :  { %400 = vmax.xlane.f32.xlu0 %v399_v5  ;;  %270 = vmatpush.bf16.msra.mxu1 %v646_v12 }
  0x21   :  { %210 = vmatpush.bf16.msra.mxu0 %v637_v7  ;;  %427 = vmatpush.bf16.msra.mxu3 %v637_v7 }
  0x23   :  { %271 = vmatpush.bf16.msra.mxu1 %v645_v14 }
  0x25   :  { %211 = vmatpush.bf16.msra.mxu0 %v636_v9  ;;  %428 = vmatpush.bf16.msra.mxu3 %v636_v9 }
  0x27   :  { %272 = vmatpush.bf16.msra.mxu1 %v644_v16 }
  0x29   :  { %212 = vmatpush.bf16.msra.mxu0 %v635_v11  ;;  %429 = vmatpush.bf16.msra.mxu3 %v635_v11 }
  0x2b   :  { %273 = vmatpush.bf16.msra.mxu1 %v643_v17 }
  0x2d   :  { %213 = vmatpush.bf16.msra.mxu0 %v634_v13  ;;  %430 = vmatpush.bf16.msra.mxu3 %v634_v13 }
  0x2f   :  { %274 = vmatpush.bf16.msra.mxu1 %v642_v18 }
  0x31   :  { %214 = vmatpush.bf16.msra.mxu0 %v633_v15  ;;  %431 = vmatpush.bf16.msra.mxu3 %v633_v15 }
  0x33   :  { %275 = vmatpush.bf16.msra.mxu1 %v641_v20 }
  0x35   :  { %437 = vmatpush.bf16.msrb.mxu0 %v648_v8  ;;  %v698_v8 = vld [vmem:[%s946_s4] ss:$0 sm:$0xff]  ;;  %s847_s4 = smov [#allocation10]  }
  0x36   :  { %s520_s15 = sshll.u32 %s847_s4, 4  ;;  %s521_s15 = int_to_ptr.vmem [resolvable:$true] %s520_s15 }
  0x39   :  { %438 = vmatpush.bf16.msrb.mxu0 %v647_v10 }
  0x3d   :  { %439 = vmatpush.bf16.msrb.mxu0 %v646_v12 }
  0x41   :  { %440 = vmatpush.bf16.msrb.mxu0 %v645_v14 }
  0x45   :  { %441 = vmatpush.bf16.msrb.mxu0 %v644_v16 }
  0x49   :  { %442 = vmatpush.bf16.msrb.mxu0 %v643_v17 }
  0x4d   :  { %443 = vmatpush.bf16.msrb.mxu0 %v642_v18 }
  0x51   :  { %444 = vmatpush.bf16.msrb.mxu0 %v641_v20 }
  0x8a   :  { %v136_v19 = vpop.xlane.xlu0 %135 }
  0x8b   :  { %v899_v21 = vmax.f32 %v136_v19, 1e-05 }
  0x8d   :  { %699 = vrcp.f32 %v899_v21  ;;  %v149_v27 = vand.u32 2147483648, %v899_v21  ;;  %v147_v29 = vand.u32 2147483647, %v899_v21  ;;  %vm143_vm1 = vweird.f32 %v899_v21 }
  0x8f   :  { %v150_v32 = vor.u32 1.1754944e-38, %v149_v27  ;;  %vm148_vm3 = vcmp.eq.f32.partialorder %v147_v29, 8.507059e+37  ;;  %v158_v27 = vmul.f32 0.007874016, %v899_v21 }
  0x92   :  { %v401_v22 = vpop.xlane.xlu0 %400 }
  0x93   :  { %v700_v23 = vpop.eup %699  ;;  %v902_v24 = vmax.f32 %v401_v22, 1e-05 }
  0x94   :  { %v139_v25 = vmul.f32 %v700_v23, %v899_v21  ;;  %vm144_vm0 = vweird.f32 %v700_v23 }
  0x95   :  { %701 = vrcp.f32 %v902_v24  ;;  %vm145_vm2 = vmor %vm143_vm1, %vm144_vm0  ;;  %v414_v38 = vand.u32 2147483648, %v902_v24  ;;  %v412_v41 = vand.u32 2147483647, %v902_v24  ;;  %vm408_vm5 = vweird.f32 %v902_v24 }
  0x96   :  { %v140_v26 = vsub.f32 1.0, %v139_v25 }
  0x97   :  { %v415_v44 = vor.u32 1.1754944e-38, %v414_v38  ;;  %vm413_vm7 = vcmp.eq.f32.partialorder %v412_v41, 8.507059e+37  ;;  %v654_v41 = vld [vmem:[#allocation8 + $0x28] sm:$0xff] }
  0x98   :  { %v141_v28 = vmul.f32 %v700_v23, %v140_v26 }
  0x9a   :  { %v142_v30 = vadd.f32 %v700_v23, %v141_v28  ;;  %v291_v28 = vmul.f32 %v158_v27, %v158_v27 }
  0x9b   :  { %v702_v31 = vpop.eup %701 }
  0x9c   :  { %v404_v33 = vmul.f32 %v702_v31, %v902_v24  ;;  %v146_v34 = vsel %vm145_vm2, %v700_v23, %v142_v30  ;;  %vm409_vm4 = vweird.f32 %v702_v31  ;;  %v292_v29 = vmul.f32 %v291_v28, %v158_v27 }
  0x9d   :  { %v151_v35 = vsel %vm148_vm3, %v150_v32, %v146_v34  ;;  %vm410_vm6 = vmor %vm408_vm5, %vm409_vm4 }
  0x9e   :  { %v405_v36 = vsub.f32 1.0, %v404_v33  ;;  %v152_v37 = vmul.f32 127.0, %v151_v35  ;;  %v293_v30 = vmul.f32 %v292_v29, %v292_v29  ;;  %v423_v33 = vmul.f32 0.007874016, %v902_v24 }
  0xa0   :  { %v406_v39 = vmul.f32 %v702_v31, %v405_v36  ;;  %v153_v40 = vmul.f32 %v152_v37, %v893_v0  ;;  %v457_v36 = vmul.f32 %v423_v33, %v423_v33  ;;  %v656_v37 = vld [vmem:[#allocation8 + $0x38] sm:$0xff] }
  0xa1   :  { %383 = vmatpush.bf16.msra.mxu2 %v656_v37  ;;  %501 = vmatpush.bf16.msrb.mxu1 %v656_v37 }
  0xa2   :  { %v659_v42 = vcvt.f32.s32 %v153_v40  ;;  %v407_v43 = vadd.f32 %v702_v31, %v406_v39  ;;  %v657_v47 = vand.u32 2147483647, %v153_v40  ;;  %v662_v50 = vand.u32 2147483648, %v153_v40  ;;  %v655_v39 = vld [vmem:[#allocation8 + $0x30] sm:$0xff] }
  0xa3   :  { %v458_v38 = vmul.f32 %v457_v36, %v423_v33 }
  0xa4   :  { %v660_v45 = vcvt.s32.f32 %v659_v42  ;;  %v411_v46 = vsel %vm410_vm6, %v702_v31, %v407_v43  ;;  %vm658_vm8 = vcmp.lt.f32.partialorder %v657_v47, 8388608.0 }
  0xa5   :  { %v416_v48 = vsel %vm413_vm7, %v415_v44, %v411_v46  ;;  %384 = vmatpush.bf16.msra.mxu2 %v655_v39  ;;  %502 = vmatpush.bf16.msrb.mxu1 %v655_v39  ;;  %v459_v21 = vmul.f32 %v458_v38, %v458_v38  ;;  %v653_v46 = vld [vmem:[#allocation8 + $0x20] sm:$0xff] }
  0xa6   :  { %v661_v49 = vand.u32 2147483647, %v660_v45  ;;  %v417_v51 = vmul.f32 127.0, %v416_v48 }
  0xa8   :  { %v663_v52 = vor.u32 %v662_v50, %v661_v49  ;;  %v418_v53 = vmul.f32 %v417_v51, %v896_v4  ;;  %v652_v50 = vld [vmem:[#allocation8 + $0x18] sm:$0xff] }
  0xa9   :  { %385 = vmatpush.bf16.msra.mxu2 %v654_v41  ;;  %503 = vmatpush.bf16.msrb.mxu1 %v654_v41 }
  0xaa   :  { %v664_v54 = vsel %vm658_vm8, %v663_v52, %v153_v40  ;;  %v675_v55 = vcvt.f32.s32 %v418_v53  ;;  %v673_v59 = vand.u32 2147483647, %v418_v53  ;;  %v678_v61 = vand.u32 2147483648, %v418_v53 }
  0xab   :  { %v155_v56 = vmax.f32 %v664_v54, -128.0  ;;  %v651_v54 = vld [vmem:[#allocation8 + $0x10] sm:$0xff] }
  0xac   :  { %v676_v57 = vcvt.s32.f32 %v675_v55  ;;  %vm674_vm9 = vcmp.lt.f32.partialorder %v673_v59, 8388608.0 }
  0xad   :  { %v156_v58 = vmin.f32 %v155_v56, 127.0  ;;  %386 = vmatpush.bf16.msra.mxu2 %v653_v46  ;;  %504 = vmatpush.bf16.msrb.mxu1 %v653_v46 }
  0xae   :  { %v677_v60 = vand.u32 2147483647, %v676_v57 }
  0xaf   :  { %v157_v62 = vpack.c.bf16 %v156_v58, %v156_v58 }
  0xb0   :  { %v679_v63 = vor.u32 %v678_v61, %v677_v60  ;;  %v650_v60 = vld [vmem:[#allocation8 + $0x8] sm:$0xff] }
  0xb1   :  { %215 = vmatmul.bf16.vlgmr.msra.gmra.mxu0 %v157_v62  ;;  %276 = vmatmul.bf16.vlgmr.msra.gmra.mxu1 %v157_v62 }
  0xb2   :  { %v680_v0 = vsel %vm674_vm9, %v679_v63, %v418_v53  ;;  %387 = vmatpush.bf16.msra.mxu2 %v652_v50  ;;  %505 = vmatpush.bf16.msrb.mxu1 %v652_v50  ;;  %v649_v63 = vld [vmem:[#allocation8] sm:$0xff] }
  0xb3   :  { %v420_v1 = vmax.f32 %v680_v0, -128.0 }
  0xb5   :  { %v421_v2 = vmin.f32 %v420_v1, 127.0 }
  0xb6   :  { %388 = vmatpush.bf16.msra.mxu2 %v651_v54  ;;  %506 = vmatpush.bf16.msrb.mxu1 %v651_v54 }
  0xb7   :  { %v422_v3 = vpack.c.bf16 %v421_v2, %v421_v2 }
  0xb9   :  { %432 = vmatmul.bf16.vlgmr.msra.gmra.mxu3 %v422_v3 }
  0xba   :  { %389 = vmatpush.bf16.msra.mxu2 %v650_v60  ;;  %507 = vmatpush.bf16.msrb.mxu1 %v650_v60 }
  0xbe   :  { %390 = vmatpush.bf16.msra.mxu2 %v649_v63  ;;  %508 = vmatpush.bf16.msrb.mxu1 %v649_v63 }
  0xc1   :  { %445 = vmatmul.bf16.vlgmr.msrb.gmra.mxu0 %v422_v3 }
 0x12e   :  { %v216_v4 = vpop.f32.mrf.mxu0  ;;  %v277_v5 = vpop.f32.mrf.mxu1 }
 0x12f   :  { %v281_v6 = vmax.f32 %v216_v4, 0.0 }
 0x131   :  { %v282_v7 = vmul.f32 %v281_v6, %v281_v6 }
 0x133   :  { %v283_v9 = vmul.f32 %v282_v7, %v277_v5 }
 0x135   :  { %v288_v10 = vmul.f32 %v283_v9, %v283_v9  ;;  %v918_v11 = vmul.f32 %v698_v8, %v283_v9 }
 0x136   :  { %v218_v12 = vpop.f32.mrf.mxu0  ;;  %v279_v13 = vpop.f32.mrf.mxu1 }
 0x137   :  { %289 = vadd.xlane.f32.xlu1 %v288_v10  ;;  %v308_v14 = vand.u32 2147483647, %v918_v11 }
 0x139   :  { %309 = vmax.xlane.f32.xlu2 %v308_v14 }
 0x13c   :  { %v433_v15 = vpop.f32.mrf.mxu3 }
 0x13d   :  { %v450_v16 = vmax.f32 %v433_v15, 0.0 }
 0x13e   :  { %v446_v17 = vpop.f32.mrf.mxu0 }
 0x13f   :  { %v451_v18 = vmul.f32 %v450_v16, %v450_v16 }
 0x141   :  { %v452_v19 = vmul.f32 %v451_v18, %v446_v17 }
 0x143   :  { %v921_v20 = vmul.f32 %v698_v8, %v452_v19  ;;  %v454_v22 = vmul.f32 %v452_v19, %v452_v19 }
 0x144   :  { %v435_v23 = vpop.f32.mrf.mxu3 }
 0x145   :  { %455 = vadd.xlane.f32.xlu1 %v454_v22  ;;  %v474_v25 = vand.u32 2147483647, %v921_v20 }
 0x146   :  { %v448_v26 = vpop.f32.mrf.mxu0 }
 0x147   :  { %475 = vmax.xlane.f32.xlu2 %v474_v25 }
 0x1aa   :  { %v290_v31 = vpop.xlane.xlu1 %289 }
 0x1ab   :  { %v294_v32 = vmul.f32 %v293_v30, %v290_v31 }
 0x1ac   :  { %v310_v55 = vpop.xlane.xlu2 %309 }
 0x1ad   :  { %v295_v34 = vmul.f32 0.015625, %v294_v32 }
 0x1af   :  { %v296_v35 = vadd.f32 1e-05, %v295_v34 }
 0x1b1   :  { %703 = vrsqrt.f32 %v296_v35  ;;  %vm303_vm11 = vweird.f32 %v296_v35 }
 0x1b7   :  { %v704_v40 = vpop.eup %703 }
 0x1b8   :  { %v298_v42 = vmul.f32 %v704_v40, %v296_v35  ;;  %v456_v43 = vpop.xlane.xlu1 %455  ;;  %vm304_vm10 = vweird.f32 %v704_v40 }
 0x1b9   :  { %v460_v44 = vmul.f32 %v459_v21, %v456_v43  ;;  %vm305_vm12 = vmor %vm303_vm11, %vm304_vm10 }
 0x1ba   :  { %v299_v24 = vmul.f32 %v704_v40, %v298_v42  ;;  %v476_v7 = vpop.xlane.xlu2 %475 }
 0x1bb   :  { %v461_v45 = vmul.f32 0.015625, %v460_v44 }
 0x1bc   :  { %v300_v47 = vmul.f32 0.5, %v299_v24 }
 0x1bd   :  { %v462_v48 = vadd.f32 1e-05, %v461_v45 }
 0x1be   :  { %v301_v49 = vsub.f32 1.5, %v300_v47 }
 0x1bf   :  { %705 = vrsqrt.f32 %v462_v48  ;;  %vm469_vm14 = vweird.f32 %v462_v48 }
 0x1c0   :  { %v302_v51 = vmul.f32 %v704_v40, %v301_v49 }
 0x1c2   :  { %v306_v52 = vsel %vm305_vm12, %v704_v40, %v302_v51 }
 0x1c3   :  { %v307_v53 = vmul.f32 %v306_v52, %v292_v29 }
 0x1c5   :  { %v706_v56 = vpop.eup %705  ;;  %v311_v57 = vmul.f32 %v310_v55, %v307_v53 }
 0x1c6   :  { %v464_v58 = vmul.f32 %v706_v56, %v462_v48  ;;  %vm470_vm13 = vweird.f32 %v706_v56 }
 0x1c7   :  { %v926_v59 = vmax.f32 %v311_v57, 1e-05  ;;  %vm471_vm15 = vmor %vm469_vm14, %vm470_vm13 }
 0x1c8   :  { %v465_v61 = vmul.f32 %v706_v56, %v464_v58 }
 0x1c9   :  { %707 = vrcp.f32 %v926_v59  ;;  %v324_v8 = vand.u32 2147483648, %v926_v59  ;;  %v322_v12 = vand.u32 2147483647, %v926_v59  ;;  %vm318_vm1 = vweird.f32 %v926_v59 }
 0x1ca   :  { %v466_v62 = vmul.f32 0.5, %v465_v61  ;;  %v334_v54 = vmul.f32 0.007874016, %v926_v59 }
 0x1cb   :  { %v325_v15 = vor.u32 1.1754944e-38, %v324_v8  ;;  %vm323_vm3 = vcmp.eq.f32.partialorder %v322_v12, 8.507059e+37 }
 0x1cc   :  { %v467_v0 = vsub.f32 1.5, %v466_v62 }
 0x1ce   :  { %v468_v1 = vmul.f32 %v706_v56, %v467_v0 }
 0x1cf   :  { %v708_v2 = vpop.eup %707 }
 0x1d0   :  { %v314_v3 = vmul.f32 %v708_v2, %v926_v59  ;;  %v472_v4 = vsel %vm471_vm15, %v706_v56, %v468_v1  ;;  %vm319_vm0 = vweird.f32 %v708_v2 }
 0x1d1   :  { %v473_v5 = vmul.f32 %v472_v4, %v458_v38  ;;  %vm320_vm2 = vmor %vm318_vm1, %vm319_vm0 }
 0x1d2   :  { %v315_v6 = vsub.f32 1.0, %v314_v3 }
 0x1d3   :  { %v477_v9 = vmul.f32 %v476_v7, %v473_v5 }
 0x1d4   :  { %v316_v10 = vmul.f32 %v708_v2, %v315_v6 }
 0x1d5   :  { %v478_v13 = vmax.f32 %v477_v9, 1e-05 }
 0x1d6   :  { %v317_v14 = vadd.f32 %v708_v2, %v316_v10 }
 0x1d7   :  { %709 = vrcp.f32 %v478_v13  ;;  %v490_v28 = vand.u32 2147483648, %v478_v13  ;;  %v488_v30 = vand.u32 2147483647, %v478_v13  ;;  %vm484_vm5 = vweird.f32 %v478_v13 }
 0x1d8   :  { %v321_v16 = vsel %vm320_vm2, %v708_v2, %v317_v14 }
 0x1d9   :  { %v326_v17 = vsel %vm323_vm3, %v325_v15, %v321_v16  ;;  %v491_v36 = vor.u32 1.1754944e-38, %v490_v28  ;;  %vm489_vm7 = vcmp.eq.f32.partialorder %v488_v30, 8.507059e+37 }
 0x1da   :  { %v327_v18 = vmul.f32 127.0, %v326_v17 }
 0x1dc   :  { %v328_v19 = vmul.f32 %v327_v18, %v307_v53 }
 0x1dd   :  { %v710_v22 = vpop.eup %709 }
 0x1de   :  { %v329_v23 = vmul.f32 %v328_v19, %v918_v11  ;;  %v480_v25 = vmul.f32 %v710_v22, %v478_v13  ;;  %vm485_vm4 = vweird.f32 %v710_v22 }
 0x1df   :  { %vm486_vm6 = vmor %vm484_vm5, %vm485_vm4 }
 0x1e0   :  { %v481_v26 = vsub.f32 1.0, %v480_v25  ;;  %v667_v27 = vcvt.f32.s32 %v329_v23  ;;  %v665_v32 = vand.u32 2147483647, %v329_v23  ;;  %v670_v35 = vand.u32 2147483648, %v329_v23 }
 0x1e2   :  { %v482_v29 = vmul.f32 %v710_v22, %v481_v26  ;;  %v668_v31 = vcvt.s32.f32 %v667_v27  ;;  %vm666_vm8 = vcmp.lt.f32.partialorder %v665_v32, 8388608.0 }
 0x1e4   :  { %v483_v33 = vadd.f32 %v710_v22, %v482_v29  ;;  %v669_v34 = vand.u32 2147483647, %v668_v31 }
 0x1e6   :  { %v487_v37 = vsel %vm486_vm6, %v710_v22, %v483_v33  ;;  %v671_v38 = vor.u32 %v670_v35, %v669_v34 }
 0x1e7   :  { %v492_v39 = vsel %vm489_vm7, %v491_v36, %v487_v37 }
 0x1e8   :  { %v493_v11 = vmul.f32 127.0, %v492_v39  ;;  %v672_v40 = vsel %vm666_vm8, %v671_v38, %v329_v23 }
 0x1e9   :  { %v331_v21 = vmax.f32 %v672_v40, -128.0 }
 0x1ea   :  { %v494_v41 = vmul.f32 %v493_v11, %v473_v5 }
 0x1eb   :  { %v332_v42 = vmin.f32 %v331_v21, 127.0 }
 0x1ec   :  { %v495_v43 = vmul.f32 %v494_v41, %v921_v20  ;;  %v500_v20 = vmul.f32 0.007874016, %v478_v13 }
 0x1ed   :  { %v333_v44 = vpack.c.bf16 %v332_v42, %v332_v42 }
 0x1ee   :  { %v683_v24 = vcvt.f32.s32 %v495_v43  ;;  %v681_v46 = vand.u32 2147483647, %v495_v43  ;;  %v686_v48 = vand.u32 2147483648, %v495_v43 }
 0x1ef   :  { %391 = vmatmul.bf16.vlgmr.msra.gmra.mxu2 %v333_v44 }
 0x1f0   :  { %v684_v45 = vcvt.s32.f32 %v683_v24  ;;  %vm682_vm9 = vcmp.lt.f32.partialorder %v681_v46, 8388608.0 }
 0x1f2   :  { %v685_v47 = vand.u32 2147483647, %v684_v45 }
 0x1f4   :  { %v687_v49 = vor.u32 %v686_v48, %v685_v47 }
 0x1f6   :  { %v688_v50 = vsel %vm682_vm9, %v687_v49, %v495_v43 }
 0x1f7   :  { %v497_v51 = vmax.f32 %v688_v50, -128.0 }
 0x1f9   :  { %v498_v52 = vmin.f32 %v497_v51, 127.0 }
 0x1fb   :  { %v499_v53 = vpack.c.bf16 %v498_v52, %v498_v52 }
 0x1fd   :  { %509 = vmatmul.bf16.vlgmr.msrb.gmra.mxu1 %v499_v53 }
 0x272   :  { %v392_v55 = vpop.f32.mrf.mxu2 }
 0x273   :  { %v396_v56 = vmul.f32 %v392_v55, %v334_v54 }
 0x275   :  { %397 = vst [vmem:[#allocation10] sm:$0xff] %v396_v56 }
 0x27a   :  { %v394_v57 = vpop.f32.mrf.mxu2  ;;  %v510_v58 = vpop.f32.mrf.mxu1 }
 0x27b   :  { %v514_v60 = vmul.f32 %v510_v58, %v500_v20 }
 0x27d   :  { %515 = vst [vmem:[#allocation10 + $0x8] sm:$0xff] %v514_v60 }
 0x27e   :  { %528 = dma.vmem_to_hbm [thread:$0]  %s521_s15, 256, %s523_s18, [#allocation4], %s843_s30, %s843_s30, %s844_s6  }
 0x282   :  { %v512_v59 = vpop.f32.mrf.mxu1 }
 0x283   :  { %837 = dma.done.wait [#allocation4], 256  }
 0x284   :  { %838 = vsyncadd [#allocation4], 4294967040 }
 0x285   :  { %533 = vsyncpa [#allocation3], 1 }
 0x286   :  { %534 = vsyncpa [#allocation6], 1 }
 0x287   :  { %535 = vsyncpa [#allocation9], 1 }
 0x288   :  { %536 = vsyncpa [#allocation4], 1 }

// kernel: tpu_custom_call.1
= control target key start
LH: loop header
LB: loop body
LE: loop exit
PB: predicated region body
PF: predicated region fallthrough
CT: control target
= control target key end

     0   :  { %10 = vsyncpa [#allocation3], 0  ;;  %s942_s0 = inlined_call_operand.hbm [shape: f32[16,128], index: 0, kind: input, shape index: {}]   ;;  %s943_s1 = inlined_call_operand.hbm [shape: bf16[128,128], index: 1, kind: input, shape index: {}]   ;;  %s944_s2 = inlined_call_operand.hbm [shape: bf16[128,128], index: 2, kind: input, shape index: {}]   ;;  %s945_s3 = inlined_call_operand.hbm [shape: bf16[128,128], index: 3, kind: input, shape index: {}]   ;;  %s946_s4 = inlined_call_operand.vmem [shape: f32[1,128], index: 4, kind: input, shape index: {}]   ;;  %s947_s5 = inlined_call_operand.hbm [shape: f32[16,128], index: 5, kind: output, shape index: {}]  }
   0x1   :  { %11 = vsyncpa [#allocation6], 0 }
   0x2   :  { %12 = vsyncpa [#allocation9], 0  ;;  %s31_s20 = sshll.u32 %s943_s1, 4  ;;  %s32_s20 = int_to_ptr.hbm [resolvable:$true] %s31_s20 }
   0x3   :  { %13 = vsyncpa [#allocation4], 0  ;;  %s839_s21 = smov [#allocation5]   ;;  %s18_s25 = sshll.u32 %s942_s0, 4  ;;  %s19_s25 = int_to_ptr.hbm [resolvable:$true] %s18_s25 }
   0x4   :  { %s33_s22 = sshll.u32 %s839_s21, 4  ;;  %s840_s26 = smov 64   ;;  %s34_s22 = int_to_ptr.vmem [resolvable:$true] %s33_s22 }
   0x5   :  { %s841_s27 = smov 4   ;;  %s842_s28 = smov [#allocation2]  }
   0x6   :  { %39 = dma.hbm_to_vmem [thread:$0]  %s32_s20, 1024, %s34_s22, [#allocation6], %s840_s26, %s840_s26, %s841_s27  }
   0x7   :  { %s20_s29 = sshll.u32 %s842_s28, 4  ;;  %s843_s30 = smov 128   ;;  %s21_s29 = int_to_ptr.vmem [resolvable:$true] %s20_s29 }
   0x8   :  { %s844_s6 = smov 8   ;;  %s44_s8 = sshll.u32 %s944_s2, 4  ;;  %s45_s8 = int_to_ptr.hbm [resolvable:$true] %s44_s8 }
   0x9   :  { %26 = dma.hbm_to_vmem [thread:$0]  %s19_s25, 256, %s21_s29, [#allocation3], %s843_s30, %s843_s30, %s844_s6  }
   0xa   :  { %s845_s9 = smov [#allocation7]   ;;  %s57_s12 = sshll.u32 %s945_s3, 4  ;;  %s58_s12 = int_to_ptr.hbm [resolvable:$true] %s57_s12 }
   0xb   :  { %s46_s0 = sshll.u32 %s845_s9, 4  ;;  %s846_s13 = smov [#allocation8]   ;;  %s47_s0 = int_to_ptr.vmem [resolvable:$true] %s46_s0 }
   0xc   :  { %52 = dma.hbm_to_vmem [thread:$0]  %s45_s8, 1024, %s47_s0, [#allocation6], %s840_s26, %s840_s26, %s841_s27  }
   0xd   :  { %s59_s14 = sshll.u32 %s846_s13, 4  ;;  %s60_s14 = int_to_ptr.vmem [resolvable:$true] %s59_s14 }
   0xe   :  { %65 = dma.hbm_to_vmem [thread:$0]  %s58_s12, 1024, %s60_s14, [#allocation9], %s840_s26, %s840_s26, %s841_s27  }
   0xf   :  { %831 = dma.done.wait [#allocation3], 256  }
  0x10   :  { %832 = vsyncadd [#allocation3], 4294967040 }
  0x11   :  { %833 = dma.done.wait [#allocation6], 2048  }
  0x12   :  { %834 = vsyncadd [#allocation6], 4294965248 }
  0x13   :  { %835 = dma.done.wait [#allocation9], 1024  }
  0x14   :  { %836 = vsyncadd [#allocation9], 4294966272  ;;  %v893_v0 = vld [vmem:[#allocation2] sm:$0xff]  ;;  %v640_v1 = vld [vmem:[#allocation5 + $0x38] sm:$0xff]  ;;  %s522_s18 = sshll.u32 %s947_s5, 4  ;;  %s523_s18 = int_to_ptr.hbm [resolvable:$true] %s522_s18 }
  0x15   :  { %v134_v2 = vand.u32 2147483647, %v893_v0  ;;  %207 = vmatpush.bf16.msra.mxu0 %v640_v1  ;;  %v639_v3 = vld [vmem:[#allocation5 + $0x30] sm:$0xff]  ;;  %424 = vmatpush.bf16.msra.mxu3 %v640_v1  ;;  %v896_v4 = vld [vmem:[#allocation2 + $0x8] sm:$0xff]  ;;  %v638_v6 = vld [vmem:[#allocation5 + $0x28] sm:$0xff] }
  0x16   :  { %v399_v5 = vand.u32 2147483647, %v896_v4  ;;  %v637_v7 = vld [vmem:[#allocation5 + $0x20] sm:$0xff]  ;;  %v648_v8 = vld [vmem:[#allocation7 + $0x38] sm:$0xff]  ;;  %v647_v10 = vld [vmem:[#allocation7 + $0x30] sm:$0xff] }
  0x17   :  { %135 = vmax.xlane.f32.xlu0 %v134_v2  ;;  %268 = vmatpush.bf16.msra.mxu1 %v648_v8  ;;  %v636_v9 = vld [vmem:[#allocation5 + $0x18] sm:$0xff]  ;;  %v635_v11 = vld [vmem:[#allocation5 + $0x10] sm:$0xff]  ;;  %v646_v12 = vld [vmem:[#allocation7 + $0x28] sm:$0xff] }
  0x18   :  { %v634_v13 = vld [vmem:[#allocation5 + $0x8] sm:$0xff]  ;;  %v645_v14 = vld [vmem:[#allocation7 + $0x20] sm:$0xff]  ;;  %v644_v16 = vld [vmem:[#allocation7 + $0x18] sm:$0xff] }
  0x19   :  { %208 = vmatpush.bf16.msra.mxu0 %v639_v3  ;;  %425 = vmatpush.bf16.msra.mxu3 %v639_v3  ;;  %v633_v15 = vld [vmem:[#allocation5] sm:$0xff]  ;;  %v643_v17 = vld [vmem:[#allocation7 + $0x10] sm:$0xff]  ;;  %v642_v18 = vld [vmem:[#allocation7 + $0x8] sm:$0xff] }
  0x1a   :  { %v641_v20 = vld [vmem:[#allocation7] sm:$0xff] }
  0x1b   :  { %269 = vmatpush.bf16.msra.mxu1 %v647_v10 }
  0x1d   :  { %209 = vmatpush.bf16.msra.mxu0 %v638_v6  ;;  %426 = vmatpush.bf16.msra.mxu3 %v638_v6 }
  0x1f   :  { %400 = vmax.xlane.f32.xlu0 %v399_v5  ;;  %270 = vmatpush.bf16.msra.mxu1 %v646_v12 }
  0x21   :  { %210 = vmatpush.bf16.msra.mxu0 %v637_v7  ;;  %427 = vmatpush.bf16.msra.mxu3 %v637_v7 }
  0x23   :  { %271 = vmatpush.bf16.msra.mxu1 %v645_v14 }
  0x25   :  { %211 = vmatpush.bf16.msra.mxu0 %v636_v9  ;;  %428 = vmatpush.bf16.msra.mxu3 %v636_v9 }
  0x27   :  { %272 = vmatpush.bf16.msra.mxu1 %v644_v16 }
  0x29   :  { %212 = vmatpush.bf16.msra.mxu0 %v635_v11  ;;  %429 = vmatpush.bf16.msra.mxu3 %v635_v11 }
  0x2b   :  { %273 = vmatpush.bf16.msra.mxu1 %v643_v17 }
  0x2d   :  { %213 = vmatpush.bf16.msra.mxu0 %v634_v13  ;;  %430 = vmatpush.bf16.msra.mxu3 %v634_v13 }
  0x2f   :  { %274 = vmatpush.bf16.msra.mxu1 %v642_v18 }
  0x31   :  { %214 = vmatpush.bf16.msra.mxu0 %v633_v15  ;;  %431 = vmatpush.bf16.msra.mxu3 %v633_v15 }
  0x33   :  { %275 = vmatpush.bf16.msra.mxu1 %v641_v20 }
  0x35   :  { %437 = vmatpush.bf16.msrb.mxu0 %v648_v8  ;;  %v698_v8 = vld [vmem:[%s946_s4] ss:$0 sm:$0xff]  ;;  %s847_s4 = smov [#allocation10]  }
  0x36   :  { %s520_s15 = sshll.u32 %s847_s4, 4  ;;  %s521_s15 = int_to_ptr.vmem [resolvable:$true] %s520_s15 }
  0x39   :  { %438 = vmatpush.bf16.msrb.mxu0 %v647_v10 }
  0x3d   :  { %439 = vmatpush.bf16.msrb.mxu0 %v646_v12 }
  0x41   :  { %440 = vmatpush.bf16.msrb.mxu0 %v645_v14 }
  0x45   :  { %441 = vmatpush.bf16.msrb.mxu0 %v644_v16 }
  0x49   :  { %442 = vmatpush.bf16.msrb.mxu0 %v643_v17 }
  0x4d   :  { %443 = vmatpush.bf16.msrb.mxu0 %v642_v18 }
  0x51   :  { %444 = vmatpush.bf16.msrb.mxu0 %v641_v20 }
  0x8a   :  { %v136_v19 = vpop.xlane.xlu0 %135 }
  0x8b   :  { %v899_v21 = vmax.f32 %v136_v19, 1e-05 }
  0x8d   :  { %699 = vrcp.f32 %v899_v21  ;;  %v149_v27 = vand.u32 2147483648, %v899_v21  ;;  %v147_v29 = vand.u32 2147483647, %v899_v21  ;;  %vm143_vm1 = vweird.f32 %v899_v21 }
  0x8f   :  { %v150_v32 = vor.u32 1.1754944e-38, %v149_v27  ;;  %vm148_vm3 = vcmp.eq.f32.partialorder %v147_v29, 8.507059e+37  ;;  %v158_v27 = vmul.f32 0.007874016, %v899_v21 }
  0x92   :  { %v401_v22 = vpop.xlane.xlu0 %400 }
  0x93   :  { %v700_v23 = vpop.eup %699  ;;  %v902_v24 = vmax.f32 %v401_v22, 1e-05 }
  0x94   :  { %v139_v25 = vmul.f32 %v700_v23, %v899_v21  ;;  %vm144_vm0 = vweird.f32 %v700_v23 }
  0x95   :  { %701 = vrcp.f32 %v902_v24  ;;  %vm145_vm2 = vmor %vm143_vm1, %vm144_vm0  ;;  %v414_v38 = vand.u32 2147483648, %v902_v24  ;;  %v412_v41 = vand.u32 2147483647, %v902_v24  ;;  %vm408_vm5 = vweird.f32 %v902_v24 }
  0x96   :  { %v140_v26 = vsub.f32 1.0, %v139_v25 }
  0x97   :  { %v415_v44 = vor.u32 1.1754944e-38, %v414_v38  ;;  %vm413_vm7 = vcmp.eq.f32.partialorder %v412_v41, 8.507059e+37  ;;  %v654_v41 = vld [vmem:[#allocation8 + $0x28] sm:$0xff] }
  0x98   :  { %v141_v28 = vmul.f32 %v700_v23, %v140_v26 }
  0x9a   :  { %v142_v30 = vadd.f32 %v700_v23, %v141_v28  ;;  %v291_v28 = vmul.f32 %v158_v27, %v158_v27 }
  0x9b   :  { %v702_v31 = vpop.eup %701 }
  0x9c   :  { %v404_v33 = vmul.f32 %v702_v31, %v902_v24  ;;  %v146_v34 = vsel %vm145_vm2, %v700_v23, %v142_v30  ;;  %vm409_vm4 = vweird.f32 %v702_v31  ;;  %v292_v29 = vmul.f32 %v291_v28, %v158_v27 }
  0x9d   :  { %v151_v35 = vsel %vm148_vm3, %v150_v32, %v146_v34  ;;  %vm410_vm6 = vmor %vm408_vm5, %vm409_vm4 }
  0x9e   :  { %v405_v36 = vsub.f32 1.0, %v404_v33  ;;  %v152_v37 = vmul.f32 127.0, %v151_v35  ;;  %v293_v30 = vmul.f32 %v292_v29, %v292_v29  ;;  %v423_v33 = vmul.f32 0.007874016, %v902_v24 }
  0xa0   :  { %v406_v39 = vmul.f32 %v702_v31, %v405_v36  ;;  %v153_v40 = vmul.f32 %v152_v37, %v893_v0  ;;  %v457_v36 = vmul.f32 %v423_v33, %v423_v33  ;;  %v656_v37 = vld [vmem:[#allocation8 + $0x38] sm:$0xff] }
  0xa1   :  { %383 = vmatpush.bf16.msra.mxu2 %v656_v37  ;;  %501 = vmatpush.bf16.msrb.mxu1 %v656_v37 }
  0xa2   :  { %v659_v42 = vcvt.f32.s32 %v153_v40  ;;  %v407_v43 = vadd.f32 %v702_v31, %v406_v39  ;;  %v657_v47 = vand.u32 2147483647, %v153_v40  ;;  %v662_v50 = vand.u32 2147483648, %v153_v40  ;;  %v655_v39 = vld [vmem:[#allocation8 + $0x30] sm:$0xff] }
  0xa3   :  { %v458_v38 = vmul.f32 %v457_v36, %v423_v33 }
  0xa4   :  { %v660_v45 = vcvt.s32.f32 %v659_v42  ;;  %v411_v46 = vsel %vm410_vm6, %v702_v31, %v407_v43  ;;  %vm658_vm8 = vcmp.lt.f32.partialorder %v657_v47, 8388608.0 }
  0xa5   :  { %v416_v48 = vsel %vm413_vm7, %v415_v44, %v411_v46  ;;  %384 = vmatpush.bf16.msra.mxu2 %v655_v39  ;;  %502 = vmatpush.bf16.msrb.mxu1 %v655_v39  ;;  %v459_v21 = vmul.f32 %v458_v38, %v458_v38  ;;  %v653_v46 = vld [vmem:[#allocation8 + $0x20] sm:$0xff] }
  0xa6   :  { %v661_v49 = vand.u32 2147483647, %v660_v45  ;;  %v417_v51 = vmul.f32 127.0, %v416_v48 }
  0xa8   :  { %v663_v52 = vor.u32 %v662_v50, %v661_v49  ;;  %v418_v53 = vmul.f32 %v417_v51, %v896_v4  ;;  %v652_v50 = vld [vmem:[#allocation8 + $0x18] sm:$0xff] }
  0xa9   :  { %385 = vmatpush.bf16.msra.mxu2 %v654_v41  ;;  %503 = vmatpush.bf16.msrb.mxu1 %v654_v41 }
  0xaa   :  { %v664_v54 = vsel %vm658_vm8, %v663_v52, %v153_v40  ;;  %v675_v55 = vcvt.f32.s32 %v418_v53  ;;  %v673_v59 = vand.u32 2147483647, %v418_v53  ;;  %v678_v61 = vand.u32 2147483648, %v418_v53 }
  0xab   :  { %v155_v56 = vmax.f32 %v664_v54, -128.0  ;;  %v651_v54 = vld [vmem:[#allocation8 + $0x10] sm:$0xff] }
  0xac   :  { %v676_v57 = vcvt.s32.f32 %v675_v55  ;;  %vm674_vm9 = vcmp.lt.f32.partialorder %v673_v59, 8388608.0 }
  0xad   :  { %v156_v58 = vmin.f32 %v155_v56, 127.0  ;;  %386 = vmatpush.bf16.msra.mxu2 %v653_v46  ;;  %504 = vmatpush.bf16.msrb.mxu1 %v653_v46 }
  0xae   :  { %v677_v60 = vand.u32 2147483647, %v676_v57 }
  0xaf   :  { %v157_v62 = vpack.c.bf16 %v156_v58, %v156_v58 }
  0xb0   :  { %v679_v63 = vor.u32 %v678_v61, %v677_v60  ;;  %v650_v60 = vld [vmem:[#allocation8 + $0x8] sm:$0xff] }
  0xb1   :  { %215 = vmatmul.bf16.vlgmr.msra.gmra.mxu0 %v157_v62  ;;  %276 = vmatmul.bf16.vlgmr.msra.gmra.mxu1 %v157_v62 }
  0xb2   :  { %v680_v0 = vsel %vm674_vm9, %v679_v63, %v418_v53  ;;  %387 = vmatpush.bf16.msra.mxu2 %v652_v50  ;;  %505 = vmatpush.bf16.msrb.mxu1 %v652_v50  ;;  %v649_v63 = vld [vmem:[#allocation8] sm:$0xff] }
  0xb3   :  { %v420_v1 = vmax.f32 %v680_v0, -128.0 }
  0xb5   :  { %v421_v2 = vmin.f32 %v420_v1, 127.0 }
  0xb6   :  { %388 = vmatpush.bf16.msra.mxu2 %v651_v54  ;;  %506 = vmatpush.bf16.msrb.mxu1 %v651_v54 }
  0xb7   :  { %v422_v3 = vpack.c.bf16 %v421_v2, %v421_v2 }
  0xb9   :  { %432 = vmatmul.bf16.vlgmr.msra.gmra.mxu3 %v422_v3 }
  0xba   :  { %389 = vmatpush.bf16.msra.mxu2 %v650_v60  ;;  %507 = vmatpush.bf16.msrb.mxu1 %v650_v60 }
  0xbe   :  { %390 = vmatpush.bf16.msra.mxu2 %v649_v63  ;;  %508 = vmatpush.bf16.msrb.mxu1 %v649_v63 }
  0xc1   :  { %445 = vmatmul.bf16.vlgmr.msrb.gmra.mxu0 %v422_v3 }
 0x12e   :  { %v216_v4 = vpop.f32.mrf.mxu0  ;;  %v277_v5 = vpop.f32.mrf.mxu1 }
 0x12f   :  { %v281_v6 = vmax.f32 %v216_v4, 0.0 }
 0x131   :  { %v282_v7 = vmul.f32 %v281_v6, %v281_v6 }
 0x133   :  { %v283_v9 = vmul.f32 %v282_v7, %v277_v5 }
 0x135   :  { %v288_v10 = vmul.f32 %v283_v9, %v283_v9  ;;  %v918_v11 = vmul.f32 %v698_v8, %v283_v9 }
 0x136   :  { %v218_v12 = vpop.f32.mrf.mxu0  ;;  %v279_v13 = vpop.f32.mrf.mxu1 }
 0x137   :  { %289 = vadd.xlane.f32.xlu1 %v288_v10  ;;  %v308_v14 = vand.u32 2147483647, %v918_v11 }
 0x139   :  { %309 = vmax.xlane.f32.xlu2 %v308_v14 }
 0x13c   :  { %v433_v15 = vpop.f32.mrf.mxu3 }
 0x13d   :  { %v450_v16 = vmax.f32 %v433_v15, 0.0 }
 0x13e   :  { %v446_v17 = vpop.f32.mrf.mxu0 }
 0x13f   :  { %v451_v18 = vmul.f32 %v450_v16, %v450_v16 }
 0x141   :  { %v452_v19 = vmul.f32 %v451_v18, %v446_v17 }
 0x143   :  { %v921_v20 = vmul.f32 %v698_v8, %v452_v19  ;;  %v454_v22 = vmul.f32 %v452_v19, %v452_v19 }
 0x144   :  { %v435_v23 = vpop.f32.mrf.mxu3 }
 0x145   :  { %455 = vadd.xlane.f32.xlu1 %v454_v22  ;;  %v474_v25 = vand.u32 2147483647, %v921_v20 }
 0x146   :  { %v448_v26 = vpop.f32.mrf.mxu0 }
 0x147   :  { %475 = vmax.xlane.f32.xlu2 %v474_v25 }
 0x1aa   :  { %v290_v31 = vpop.xlane.xlu1 %289 }
 0x1ab   :  { %v294_v32 = vmul.f32 %v293_v30, %v290_v31 }
 0x1ac   :  { %v310_v55 = vpop.xlane.xlu2 %309 }
 0x1ad   :  { %v295_v34 = vmul.f32 0.015625, %v294_v32 }
 0x1af   :  { %v296_v35 = vadd.f32 1e-05, %v295_v34 }
 0x1b1   :  { %703 = vrsqrt.f32 %v296_v35  ;;  %vm303_vm11 = vweird.f32 %v296_v35 }
 0x1b7   :  { %v704_v40 = vpop.eup %703 }
 0x1b8   :  { %v298_v42 = vmul.f32 %v704_v40, %v296_v35  ;;  %v456_v43 = vpop.xlane.xlu1 %455  ;;  %vm304_vm10 = vweird.f32 %v704_v40 }
 0x1b9   :  { %v460_v44 = vmul.f32 %v459_v21, %v456_v43  ;;  %vm305_vm12 = vmor %vm303_vm11, %vm304_vm10 }
 0x1ba   :  { %v299_v24 = vmul.f32 %v704_v40, %v298_v42  ;;  %v476_v7 = vpop.xlane.xlu2 %475 }
 0x1bb   :  { %v461_v45 = vmul.f32 0.015625, %v460_v44 }
 0x1bc   :  { %v300_v47 = vmul.f32 0.5, %v299_v24 }
 0x1bd   :  { %v462_v48 = vadd.f32 1e-05, %v461_v45 }
 0x1be   :  { %v301_v49 = vsub.f32 1.5, %v300_v47 }
 0x1bf   :  { %705 = vrsqrt.f32 %v462_v48  ;;  %vm469_vm14 = vweird.f32 %v462_v48 }
 0x1c0   :  { %v302_v51 = vmul.f32 %v704_v40, %v301_v49 }
 0x1c2   :  { %v306_v52 = vsel %vm305_vm12, %v704_v40, %v302_v51 }
 0x1c3   :  { %v307_v53 = vmul.f32 %v306_v52, %v292_v29 }
 0x1c5   :  { %v706_v56 = vpop.eup %705  ;;  %v311_v57 = vmul.f32 %v310_v55, %v307_v53 }
 0x1c6   :  { %v464_v58 = vmul.f32 %v706_v56, %v462_v48  ;;  %vm470_vm13 = vweird.f32 %v706_v56 }
 0x1c7   :  { %v926_v59 = vmax.f32 %v311_v57, 1e-05  ;;  %vm471_vm15 = vmor %vm469_vm14, %vm470_vm13 }
 0x1c8   :  { %v465_v61 = vmul.f32 %v706_v56, %v464_v58 }
 0x1c9   :  { %707 = vrcp.f32 %v926_v59  ;;  %v324_v8 = vand.u32 2147483648, %v926_v59  ;;  %v322_v12 = vand.u32 2147483647, %v926_v59  ;;  %vm318_vm1 = vweird.f32 %v926_v59 }
 0x1ca   :  { %v466_v62 = vmul.f32 0.5, %v465_v61  ;;  %v334_v54 = vmul.f32 0.007874016, %v926_v59 }
 0x1cb   :  { %v325_v15 = vor.u32 1.1754944e-38, %v324_v8  ;;  %vm323_vm3 = vcmp.eq.f32.partialorder %v322_v12, 8.507059e+37 }
 0x1cc   :  { %v467_v0 = vsub.f32 1.5, %v466_v62 }
 0x1ce   :  { %v468_v1 = vmul.f32 %v706_v56, %v467_v0 }
 0x1cf   :  { %v708_v2 = vpop.eup %707 }
 0x1d0   :  { %v314_v3 = vmul.f32 %v708_v2, %v926_v59  ;;  %v472_v4 = vsel %vm471_vm15, %v706_v56, %v468_v1  ;;  %vm319_vm0 = vweird.f32 %v708_v2 }
 0x1d1   :  { %v473_v5 = vmul.f32 %v472_v4, %v458_v38  ;;  %vm320_vm2 = vmor %vm318_vm1, %vm319_vm0 }
 0x1d2   :  { %v315_v6 = vsub.f32 1.0, %v314_v3 }
 0x1d3   :  { %v477_v9 = vmul.f32 %v476_v7, %v473_v5 }
 0x1d4   :  { %v316_v10 = vmul.f32 %v708_v2, %v315_v6 }
 0x1d5   :  { %v478_v13 = vmax.f32 %v477_v9, 1e-05 }
 0x1d6   :  { %v317_v14 = vadd.f32 %v708_v2, %v316_v10 }
 0x1d7   :  { %709 = vrcp.f32 %v478_v13  ;;  %v490_v28 = vand.u32 2147483648, %v478_v13  ;;  %v488_v30 = vand.u32 2147483647, %v478_v13  ;;  %vm484_vm5 = vweird.f32 %v478_v13 }
 0x1d8   :  { %v321_v16 = vsel %vm320_vm2, %v708_v2, %v317_v14 }
 0x1d9   :  { %v326_v17 = vsel %vm323_vm3, %v325_v15, %v321_v16  ;;  %v491_v36 = vor.u32 1.1754944e-38, %v490_v28  ;;  %vm489_vm7 = vcmp.eq.f32.partialorder %v488_v30, 8.507059e+37 }
 0x1da   :  { %v327_v18 = vmul.f32 127.0, %v326_v17 }
 0x1dc   :  { %v328_v19 = vmul.f32 %v327_v18, %v307_v53 }
 0x1dd   :  { %v710_v22 = vpop.eup %709 }
 0x1de   :  { %v329_v23 = vmul.f32 %v328_v19, %v918_v11  ;;  %v480_v25 = vmul.f32 %v710_v22, %v478_v13  ;;  %vm485_vm4 = vweird.f32 %v710_v22 }
 0x1df   :  { %vm486_vm6 = vmor %vm484_vm5, %vm485_vm4 }
 0x1e0   :  { %v481_v26 = vsub.f32 1.0, %v480_v25  ;;  %v667_v27 = vcvt.f32.s32 %v329_v23  ;;  %v665_v32 = vand.u32 2147483647, %v329_v23  ;;  %v670_v35 = vand.u32 2147483648, %v329_v23 }
 0x1e2   :  { %v482_v29 = vmul.f32 %v710_v22, %v481_v26  ;;  %v668_v31 = vcvt.s32.f32 %v667_v27  ;;  %vm666_vm8 = vcmp.lt.f32.partialorder %v665_v32, 8388608.0 }
 0x1e4   :  { %v483_v33 = vadd.f32 %v710_v22, %v482_v29  ;;  %v669_v34 = vand.u32 2147483647, %v668_v31 }
 0x1e6   :  { %v487_v37 = vsel %vm486_vm6, %v710_v22, %v483_v33  ;;  %v671_v38 = vor.u32 %v670_v35, %v669_v34 }
 0x1e7   :  { %v492_v39 = vsel %vm489_vm7, %v491_v36, %v487_v37 }
 0x1e8   :  { %v493_v11 = vmul.f32 127.0, %v492_v39  ;;  %v672_v40 = vsel %vm666_vm8, %v671_v38, %v329_v23 }
 0x1e9   :  { %v331_v21 = vmax.f32 %v672_v40, -128.0 }
 0x1ea   :  { %v494_v41 = vmul.f32 %v493_v11, %v473_v5 }
 0x1eb   :  { %v332_v42 = vmin.f32 %v331_v21, 127.0 }
 0x1ec   :  { %v495_v43 = vmul.f32 %v494_v41, %v921_v20  ;;  %v500_v20 = vmul.f32 0.007874016, %v478_v13 }
 0x1ed   :  { %v333_v44 = vpack.c.bf16 %v332_v42, %v332_v42 }
 0x1ee   :  { %v683_v24 = vcvt.f32.s32 %v495_v43  ;;  %v681_v46 = vand.u32 2147483647, %v495_v43  ;;  %v686_v48 = vand.u32 2147483648, %v495_v43 }
 0x1ef   :  { %391 = vmatmul.bf16.vlgmr.msra.gmra.mxu2 %v333_v44 }
 0x1f0   :  { %v684_v45 = vcvt.s32.f32 %v683_v24  ;;  %vm682_vm9 = vcmp.lt.f32.partialorder %v681_v46, 8388608.0 }
 0x1f2   :  { %v685_v47 = vand.u32 2147483647, %v684_v45 }
 0x1f4   :  { %v687_v49 = vor.u32 %v686_v48, %v685_v47 }
 0x1f6   :  { %v688_v50 = vsel %vm682_vm9, %v687_v49, %v495_v43 }
 0x1f7   :  { %v497_v51 = vmax.f32 %v688_v50, -128.0 }
 0x1f9   :  { %v498_v52 = vmin.f32 %v497_v51, 127.0 }
 0x1fb   :  { %v499_v53 = vpack.c.bf16 %v498_v52, %v498_v52 }
 0x1fd   :  { %509 = vmatmul.bf16.vlgmr.msrb.gmra.mxu1 %v499_v53 }
 0x272   :  { %v392_v55 = vpop.f32.mrf.mxu2 }
 0x273   :  { %v396_v56 = vmul.f32 %v392_v55, %v334_v54 }
 0x275   :  { %397 = vst [vmem:[#allocation10] sm:$0xff] %v396_v56 }
 0x27a   :  { %v394_v57 = vpop.f32.mrf.mxu2  ;;  %v510_v58 = vpop.f32.mrf.mxu1 }
 0x27b   :  { %v514_v60 = vmul.f32 %v510_v58, %v500_v20 }
 0x27d   :  { %515 = vst [vmem:[#allocation10 + $0x8] sm:$0xff] %v514_v60 }
 0x27e   :  { %528 = dma.vmem_to_hbm [thread:$0]  %s521_s15, 256, %s523_s18, [#allocation4], %s843_s30, %s843_s30, %s844_s6  }
 0x282   :  { %v512_v59 = vpop.f32.mrf.mxu1 }
 0x283   :  { %837 = dma.done.wait [#allocation4], 256  }
 0x284   :  { %838 = vsyncadd [#allocation4], 4294967040 }
 0x285   :  { %533 = vsyncpa [#allocation3], 1 }
 0x286   :  { %534 = vsyncpa [#allocation6], 1 }
 0x287   :  { %535 = vsyncpa [#allocation9], 1 }
 0x288   :  { %536 = vsyncpa [#allocation4], 1 }

</bundles_post_ra>
